<compile_context>
chip_gen: v7x
topology: tpu7x:2x2x1
jax: 0.10.0
libtpu: 0.0.40
codegen_flags: <defaults>
</compile_context>

<pallas_src>
import functools

import jax
import jax.numpy as jnp
from jax.experimental import pallas as pl
from jax.experimental.pallas import tpu as pltpu


def _log_sigmoid(x):
    # Numerically stable log(sigmoid(x)) = min(x, 0) - log(1 + exp(-|x|)).
    return jnp.minimum(x, 0.0) - jnp.log(1.0 + jnp.exp(-jnp.abs(x)))


def _sgns_kernel(iv_ref, cnv_ref, out_ref, *, context, batch, cn_total,
                 block_b, block_c):
    j = pl.program_id(1)

    # The per-batch-tile output block is resident across the reduction axis.
    @pl.when(j == 0)
    def _init():
        out_ref[...] = jnp.zeros_like(out_ref)

    iv = iv_ref[...]                                    # (TB, E), native dtype
    cn = cnv_ref[...]                                   # (TB, TC, E)

    # Row-wise dot against the input-word vector (t.bmm equivalent).
    # Multiply in the native dtype (VPU), accumulate the E reduction in f32.
    score = jnp.sum(cn * iv[:, None, :], axis=-1,
                    dtype=jnp.float32)                  # (TB, TC)

    # Global column index: +1 for context columns (< C), -1 for negatives.
    col = j * block_c + jax.lax.broadcasted_iota(jnp.int32, (1, block_c), 1)
    sign = jnp.where(col < context, 1.0, -1.0)          # (1, TC)

    logsig = _log_sigmoid(score * sign)                 # (TB, TC)

    # Edge masking only when the shapes do not divide the tiles (static check).
    if (batch % block_b != 0) or (cn_total % block_c != 0):
        row = pl.program_id(0) * block_b + jax.lax.broadcasted_iota(
            jnp.int32, (block_b, 1), 0)
        valid = (row < batch) & (col < cn_total)        # (TB, TC)
        logsig = jnp.where(valid, logsig, 0.0)

    # oloss = mean_C logsig(o); nloss = sum_negs mean_C == sum_N / C, so every
    # column contributes logsig(sign * score) / C.
    per_row = jnp.sum(logsig, axis=-1, keepdims=True)   # (TB, 1)
    tile_sum = jnp.sum(per_row, axis=0, keepdims=True)  # (1, 1)
    out_ref[...] += (tile_sum / context)[:, :, None]    # (1, 1, 1)


def _pick_tiles(batch, cn_total, embed_dim, itemsize):
    """Generation-aware tile sizes + vmem limit.

    Budget covers: double-buffered input blocks plus the transient f32 product
    feeding the E-axis reduction.
    """
    try:
        vmem_cap = int(pltpu.get_tpu_info().vmem_capacity_bytes)
    except Exception:  # pragma: no cover - conservative (v7x) fallback
        vmem_cap = 64 * 2 ** 20
    budget = vmem_cap // 4

    # Bytes per (row, column) cell of the (TB, TC, E) block:
    # 2x double-buffered input copy + 4-byte f32 product temp.
    cell = embed_dim * (2 * itemsize + 4)
    iv_row = embed_dim * 2 * itemsize
    slack = 1 << 20

    def fits(tb_, tc_):
        return tb_ * tc_ * cell + tb_ * iv_row + slack <= budget

    tb_min = batch if batch < 8 else 8

    # Column tile: keep the full C+N axis when the minimum batch tile fits,
    # otherwise tile it in multiples of 8 (keeps big contiguous DMAs).
    if fits(tb_min, cn_total):
        tc = cn_total
    else:
        tc = max(8, ((budget // max(tb_min * cell, 1)) // 8) * 8)
        tc = min(tc, ((cn_total + 7) // 8) * 8)

    # Batch tile: as many rows as the budget allows.  tb == batch is always a
    # legal block height; otherwise keep it a multiple of 8.
    tb_cap = max(tb_min, (budget - slack) // max(tc * cell + iv_row, 1))
    if batch <= tb_cap:
        tb = batch
    else:
        tb = max(8, (tb_cap // 8) * 8)

    est = tb * tc * cell + tb * iv_row
    vmem_limit = int(min(vmem_cap * 0.85, max(32 * 2 ** 20, 2 * est)))
    return tb, tc, vmem_limit


def sgns_loss(ivectors_tbl, ovectors_tbl, iword, owords, nwords, n_negs):
    batch, context = owords.shape
    embed_dim = ivectors_tbl.shape[1]
    n_samples = context * n_negs
    cn_total = context + n_samples
    dtype = ivectors_tbl.dtype
    itemsize = jnp.dtype(dtype).itemsize

    # Embedding lookups (glue, plain JAX gather).  Context and negative-sample
    # indices are merged so the kernel gets one fused (B, C+N, E) input.
    iv = jnp.take(ivectors_tbl, iword, axis=0)                        # (B, E)
    cn_idx = jnp.concatenate([owords, nwords], axis=1)                # (B, C+N)
    cnv = jnp.take(ovectors_tbl, cn_idx.reshape(-1), axis=0).reshape(
        batch, cn_total, embed_dim)                                   # (B, C+N, E)

    tb, tc, vmem_limit = _pick_tiles(batch, cn_total, embed_dim, itemsize)
    grid = (pl.cdiv(batch, tb), pl.cdiv(cn_total, tc))

    kernel = functools.partial(
        _sgns_kernel, context=context, batch=batch, cn_total=cn_total,
        block_b=tb, block_c=tc)

    partials = pl.pallas_call(
        kernel,
        out_shape=jax.ShapeDtypeStruct((grid[0], 1, 1), jnp.float32),
        grid_spec=pltpu.PrefetchScalarGridSpec(
            num_scalar_prefetch=0,
            grid=grid,
            in_specs=[
                pl.BlockSpec((tb, embed_dim), lambda i, j: (i, 0)),
                pl.BlockSpec((tb, tc, embed_dim), lambda i, j: (i, j, 0)),
            ],
            out_specs=pl.BlockSpec((1, 1, 1), lambda i, j: (i, 0, 0)),
        ),
        compiler_params=pltpu.CompilerParams(
            dimension_semantics=("parallel", "arbitrary"),
            vmem_limit_bytes=vmem_limit,
        ),
    )(iv, cnv)

    # Final reduction over batch tiles + batch mean + negation (tiny, in JAX).
    return -jnp.sum(partials) / batch


def _sgns_ref(ivectors_tbl, ovectors_tbl, iword, owords, nwords, n_negs):
    """Pure-JAX reference mirroring the PyTorch forward exactly."""
    batch, context = owords.shape
    embed_dim = ivectors_tbl.shape[1]
    ivec = jnp.take(ivectors_tbl, iword, axis=0)[:, :, None]            # (B, E, 1)
    ovec = jnp.take(ovectors_tbl, owords.reshape(-1), axis=0).reshape(
        batch, context, embed_dim)                                      # (B, C, E)
    nvec = -jnp.take(ovectors_tbl, nwords.reshape(-1), axis=0).reshape(
        batch, context * n_negs, embed_dim)                             # (B, C*n, E)
    oloss = jnp.log(jax.nn.sigmoid(
        jnp.squeeze(jnp.matmul(ovec, ivec), -1))).mean(1)
    nloss = jnp.log(jax.nn.sigmoid(
        jnp.squeeze(jnp.matmul(nvec, ivec), -1))).reshape(
        -1, context, n_negs).sum(2).mean(1)
    return -(oloss + nloss).mean()


if __name__ == "__main__":
    key = jax.random.PRNGKey(0)
    vocab_size = 100
    embed_dim = 32
    batch = 2
    context = 8
    n_negs = 20

    k1, k2, k3, k4, k5 = jax.random.split(key, 5)
    # Deterministic synthetic embedding tables (embedding.ivectors / .ovectors).
    ivectors_tbl = 0.1 * jax.random.normal(k1, (vocab_size, embed_dim), jnp.float32)
    ovectors_tbl = 0.1 * jax.random.normal(k2, (vocab_size, embed_dim), jnp.float32)

    iword = jax.random.randint(k3, (batch,), 0, vocab_size)
    owords = jax.random.randint(k4, (batch, context), 0, vocab_size)
    # Negative samples: the reference draws them uniformly at runtime
    # (weights=None); here drawn deterministically from PRNGKey(0).
    nwords = jax.random.randint(k5, (batch, context * n_negs), 0, vocab_size)

    loss = sgns_loss(ivectors_tbl, ovectors_tbl, iword, owords, nwords, n_negs)
    loss = jax.block_until_ready(loss)

    ref = _sgns_ref(ivectors_tbl, ovectors_tbl, iword, owords, nwords, n_negs)
    assert jnp.allclose(loss, ref, atol=1e-5, rtol=1e-5), (loss, ref)

    print("KERNEL_OK")
</pallas_src>

<mosaic_0001>
module attributes {stable_mosaic.version = 11 : i64} {
  func.func @_sgns_kernel(%arg0: i32, %arg1: i32, %arg2: memref<2x32xf32, #tpu.memory_space<vmem>>, %arg3: memref<2x168x32xf32, #tpu.memory_space<vmem>>, %arg4: memref<1x1x1xf32, #tpu.memory_space<vmem>>) attributes {dimension_semantics = [#tpu.dimension_semantics<parallel>, #tpu.dimension_semantics<arbitrary>], iteration_bounds = array<i64: 1, 1>, scalar_prefetch = 0 : i64, scratch_operands = 0 : i64, tpu.core_type = #tpu.core_type<tc>, window_params = [{transform_indices = @transform_0, window_bounds = array<i64: 2, 32>}, {transform_indices = @transform_1, window_bounds = array<i64: 2, 168, 32>}, {transform_indices = @transform_2, window_bounds = array<i64: 1, 1, 1>}]} {
    %c0_i32 = arith.constant 0 : i32
    %0 = arith.cmpi eq, %arg1, %c0_i32 : i32
    %1 = arith.extui %0 : i1 to i32
    %c0_i32_0 = arith.constant 0 : i32
    %2 = arith.cmpi ne, %1, %c0_i32_0 : i32
    scf.if %2 {
      %cst_19 = arith.constant 0.000000e+00 : f32
      %40 = vector.broadcast %cst_19 : f32 to vector<1x1x1xf32>
      %c0_20 = arith.constant 0 : index
      %c0_21 = arith.constant 0 : index
      %c0_22 = arith.constant 0 : index
      %41 = vector.load %arg4[%c0_20, %c0_21, %c0_22] : memref<1x1x1xf32, #tpu.memory_space<vmem>>, vector<1x1x1xf32>
      tpu.vector_store %arg4[%c0_20, %c0_21, %c0_22], %40 {strides = array<i32>} : memref<1x1x1xf32, #tpu.memory_space<vmem>>, vector<1x1x1xf32>,
    } else {
    }
    %c0 = arith.constant 0 : index
    %c0_1 = arith.constant 0 : index
    %3 = vector.load %arg2[%c0, %c0_1] : memref<2x32xf32, #tpu.memory_space<vmem>>, vector<2x32xf32>
    %c0_2 = arith.constant 0 : index
    %c0_3 = arith.constant 0 : index
    %c0_4 = arith.constant 0 : index
    %4 = vector.load %arg3[%c0_2, %c0_3, %c0_4] : memref<2x168x32xf32, #tpu.memory_space<vmem>>, vector<2x168x32xf32>
    %5 = vector.shape_cast %3 : vector<2x32xf32> to vector<2x1x32xf32>
    %6 = vector.broadcast %5 : vector<2x1x32xf32> to vector<2x168x32xf32>
    %7 = arith.mulf %4, %6 : vector<2x168x32xf32>
    %cst = arith.constant dense<0.000000e+00> : vector<2x168xf32>
    %8 = vector.multi_reduction <add>, %7, %cst [2] : vector<2x168x32xf32> to vector<2x168xf32>
    %c168_i32 = arith.constant 168 : i32
    %9 = arith.muli %arg1, %c168_i32 : i32
    %10 = tpu.iota {dimensions = array<i32: 1>} : vector<1x168xi32>
    %11 = vector.broadcast %9 : i32 to vector<1x168xi32>
    %12 = arith.addi %11, %10 : vector<1x168xi32>
    %c8_i32 = arith.constant 8 : i32
    %13 = vector.broadcast %c8_i32 : i32 to vector<1x168xi32>
    %14 = arith.cmpi slt, %12, %13 : vector<1x168xi32>
    %cst_5 = arith.constant 1.000000e+00 : f32
    %cst_6 = arith.constant -1.000000e+00 : f32
    %15 = vector.broadcast %cst_5 : f32 to vector<1x168xf32>
    %16 = vector.broadcast %cst_6 : f32 to vector<1x168xf32>
    %17 = arith.select %14, %15, %16 : vector<1x168xi1>, vector<1x168xf32>
    %18 = vector.broadcast %17 : vector<1x168xf32> to vector<2x168xf32>
    %19 = arith.mulf %8, %18 : vector<2x168xf32>
    %cst_7 = arith.constant 0.000000e+00 : f32
    %20 = vector.broadcast %cst_7 : f32 to vector<2x168xf32>
    %21 = arith.minimumf %19, %20 : vector<2x168xf32>
    %22 = math.absf %19 : vector<2x168xf32>
    %cst_8 = arith.constant 0.000000e+00 : f32
    %23 = vector.broadcast %cst_8 : f32 to vector<2x168xf32>
    %24 = arith.subf %23, %22 : vector<2x168xf32>
    %25 = math.exp %24 : vector<2x168xf32>
    %cst_9 = arith.constant 1.000000e+00 : f32
    %26 = vector.broadcast %cst_9 : f32 to vector<2x168xf32>
    %27 = arith.addf %26, %25 : vector<2x168xf32>
    %28 = math.log %27 : vector<2x168xf32>
    %29 = arith.subf %21, %28 : vector<2x168xf32>
    %cst_10 = arith.constant dense<0.000000e+00> : vector<2xf32>
    %30 = vector.multi_reduction <add>, %29, %cst_10 [1] : vector<2x168xf32> to vector<2xf32>
    %31 = vector.shape_cast %30 : vector<2xf32> to vector<2x1xf32>
    %cst_11 = arith.constant dense<0.000000e+00> : vector<1xf32>
    %32 = vector.multi_reduction <add>, %31, %cst_11 [0] : vector<2x1xf32> to vector<1xf32>
    %33 = vector.shape_cast %32 : vector<1xf32> to vector<1x1xf32>
    %c0_12 = arith.constant 0 : index
    %c0_13 = arith.constant 0 : index
    %c0_14 = arith.constant 0 : index
    %34 = vector.load %arg4[%c0_12, %c0_13, %c0_14] : memref<1x1x1xf32, #tpu.memory_space<vmem>>, vector<1x1x1xf32>
    %cst_15 = arith.constant 8.000000e+00 : f32
    %35 = vector.broadcast %cst_15 : f32 to vector<1x1xf32>
    %36 = arith.divf %33, %35 : vector<1x1xf32>
    %37 = vector.shape_cast %36 : vector<1x1xf32> to vector<1x1x1xf32>
    %38 = arith.addf %34, %37 : vector<1x1x1xf32>
    %c0_16 = arith.constant 0 : index
    %c0_17 = arith.constant 0 : index
    %c0_18 = arith.constant 0 : index
    %39 = vector.load %arg4[%c0_16, %c0_17, %c0_18] : memref<1x1x1xf32, #tpu.memory_space<vmem>>, vector<1x1x1xf32>
    tpu.vector_store %arg4[%c0_16, %c0_17, %c0_18], %38 {strides = array<i32>} : memref<1x1x1xf32, #tpu.memory_space<vmem>>, vector<1x1x1xf32>,
    return
  }
  func.func @transform_0(%arg0: i32, %arg1: i32) -> (i32, i32) {
    %c0_i32 = arith.constant 0 : i32
    %c0_i32_0 = arith.constant 0 : i32
    return %arg0, %c0_i32 : i32, i32
  }
  func.func @transform_1(%arg0: i32, %arg1: i32) -> (i32, i32, i32) {
    %c0_i32 = arith.constant 0 : i32
    %c0_i32_0 = arith.constant 0 : i32
    return %arg0, %arg1, %c0_i32 : i32, i32, i32
  }
  func.func @transform_2(%arg0: i32, %arg1: i32) -> (i32, i32, i32) {
    %c0_i32 = arith.constant 0 : i32
    %c0_i32_0 = arith.constant 0 : i32
    %c0_i32_1 = arith.constant 0 : i32
    return %arg0, %c0_i32, %c0_i32_0 : i32, i32, i32
  }
}

</mosaic_0001>

<bundles_post_ra>
// kernel: tpu_custom_call.1
= control target key start
LH: loop header
LB: loop body
LE: loop exit
PB: predicated region body
PF: predicated region fallthrough
CT: control target
= control target key end

     0   :  { %v73_v0 = vlaneseq  ;;  %v1442_v1 = vmov 1966171168   ;;  %vm136_vm0 = vcmask 261120   ;;  %s2297_s0 = inlined_call_operand.vmem [shape: f32[2,32], index: 0, kind: input, shape index: {}]   ;;  %s2298_s1 = inlined_call_operand.vmem [shape: f32[2,168,32], index: 1, kind: input, shape index: {}]   ;;  %s2299_s2 = inlined_call_operand.hbm [shape: f32[1,1,1], index: 2, kind: output, shape index: {}]  }
   0x1   :  { %v71_v2 = vunpack.c.l.s4 %v1442_v1  ;;  %v1468_v5 = vld.sshfl [vmem:[%s2297_s0] sm:$0x11 pattern:$0x75316420]  ;;  %v21_v8 = vld [vmem:[%s2298_s1 + $0x10] sm:$0xff]  ;;  %v22_v11 = vld [vmem:[%s2298_s1 + $0x18] sm:$0xff] }
   0x2   :  { %v1463_v3 = vshrl.u32 %v73_v0, 7  ;;  %v19_v10 = vld [vmem:[%s2298_s1] sm:$0xff]  ;;  %v20_v12 = vld [vmem:[%s2298_s1 + $0x8] sm:$0xff] }
   0x3   :  { %v72_v4 = vunpack.c.0.s8 %v71_v2  ;;  %v24_v18 = vld [vmem:[%s2298_s1 + $0x28] sm:$0xff]  ;;  %v23_v19 = vld [vmem:[%s2298_s1 + $0x20] sm:$0xff] }
   0x4   :  { %2310 = vst [vmem:[#allocation5_spill] sm:$0xff] %v1463_v3  ;;  %v86_v7 = vsub.s32 0, %v1463_v3 }
   0x5   :  { %v1471_v6 = vsub.s32 %v72_v4, %v1463_v3 }
   0x7   :  { %v76_v9 = vrot.slane %v1468_v5, %v1471_v6 }
   0x9   :  { %v1490_v13 = vrot.slane %v76_v9, %v86_v7 }
   0xb   :  { %v96_v14 = vmul.f32 %v1490_v13, %v21_v8  ;;  %v94_v15 = vmul.f32 %v1490_v13, %v19_v10  ;;  %v97_v16 = vmul.f32 %v1490_v13, %v22_v11  ;;  %v95_v17 = vmul.f32 %v1490_v13, %v20_v12 }
   0xd   :  { %v143_v20 = vsel %vm136_vm0, %v96_v14, 0.0  ;;  %v137_v21 = vsel %vm136_vm0, %v94_v15, 0.0 }
   0xe   :  { %144 = vadd.xlane.f32.xlu1 %v143_v20  ;;  %138 = vadd.xlane.f32.xlu0 %v137_v21 }
   0xf   :  { %7 = vsyncpa [#allocation3], 0  ;;  %v146_v22 = vsel %vm136_vm0, %v97_v16, 0.0  ;;  %v140_v23 = vsel %vm136_vm0, %v95_v17, 0.0  ;;  %v99_v24 = vmul.f32 %v1490_v13, %v24_v18  ;;  %v98_v25 = vmul.f32 %v1490_v13, %v23_v19  ;;  %v26_v26 = vld [vmem:[%s2298_s1 + $0x38] sm:$0xff]  ;;  %v25_v27 = vld [vmem:[%s2298_s1 + $0x30] sm:$0xff] }
  0x10   :  { %v101_v30 = vmul.f32 %v1490_v13, %v26_v26  ;;  %v100_v31 = vmul.f32 %v1490_v13, %v25_v27  ;;  %v28_v32 = vld [vmem:[%s2298_s1 + $0x48] sm:$0xff]  ;;  %v27_v33 = vld [vmem:[%s2298_s1 + $0x40] sm:$0xff]  ;;  %v30_v38 = vld [vmem:[%s2298_s1 + $0x58] sm:$0xff]  ;;  %v69_v53 = vcombine.high %v1468_v5, %v1468_v5  ;;  %vm976_vm2 = vcmask 130112  }
  0x11   :  { %v152_v28 = vsel %vm136_vm0, %v99_v24, 0.0  ;;  %v149_v29 = vsel %vm136_vm0, %v98_v25, 0.0  ;;  %v103_v36 = vmul.f32 %v1490_v13, %v28_v32  ;;  %v102_v37 = vmul.f32 %v1490_v13, %v27_v33  ;;  %v29_v39 = vld [vmem:[%s2298_s1 + $0x50] sm:$0xff]  ;;  %v38_v41 = vld [vmem:[%s2298_s1 + $0x98] sm:$0xff]  ;;  %v39_v42 = vld [vmem:[%s2298_s1 + $0xa0] sm:$0xff] }
  0x12   :  { %147 = vadd.xlane.f32.xlu1 %v146_v22  ;;  %141 = vadd.xlane.f32.xlu0 %v140_v23  ;;  %v158_v34 = vsel %vm136_vm0, %v101_v30, 0.0  ;;  %v155_v35 = vsel %vm136_vm0, %v100_v31, 0.0  ;;  %v37_v40 = vld [vmem:[%s2298_s1 + $0x90] sm:$0xff]  ;;  %v105_v43 = vmul.f32 %v1490_v13, %v30_v38  ;;  %v104_v46 = vmul.f32 %v1490_v13, %v29_v39  ;;  %v32_v48 = vld [vmem:[%s2298_s1 + $0x68] sm:$0xff]  ;;  %v31_v49 = vld [vmem:[%s2298_s1 + $0x60] sm:$0xff] }
  0x13   :  { %v164_v44 = vsel %vm136_vm0, %v103_v36, 0.0  ;;  %v161_v45 = vsel %vm136_vm0, %v102_v37, 0.0  ;;  %v112_v47 = vmul.f32 %v1490_v13, %v37_v40  ;;  %v113_v50 = vmul.f32 %v1490_v13, %v38_v41  ;;  %v34_v60 = vld [vmem:[%s2298_s1 + $0x78] sm:$0xff]  ;;  %v33_v61 = vld [vmem:[%s2298_s1 + $0x70] sm:$0xff]  ;;  %v36_v5 = vld [vmem:[%s2298_s1 + $0x88] sm:$0xff] }
  0x14   :  { %v114_v51 = vmul.f32 %v1490_v13, %v39_v42  ;;  %v170_v56 = vsel %vm136_vm0, %v105_v43, 0.0  ;;  %v167_v57 = vsel %vm136_vm0, %v104_v46, 0.0  ;;  %v107_v58 = vmul.f32 %v1490_v13, %v32_v48  ;;  %v35_v8 = vld [vmem:[%s2298_s1 + $0x80] sm:$0xff]  ;;  %v41_v14 = vld [vmem:[%s2298_s1 + $0xb0] sm:$0xff]  ;;  %v40_v15 = vld [vmem:[%s2298_s1 + $0xa8] sm:$0xff] }
  0x15   :  { %v1557_v52 = vsel %vm136_vm0, %v112_v47, 0.0  ;;  %v1562_v54 = vsel %vm136_vm0, %v113_v50, 0.0  ;;  %v106_v59 = vmul.f32 %v1490_v13, %v31_v49  ;;  %v83_v62 = vrot.slane %v69_v53, %v1471_v6  ;;  %v42_v19 = vld [vmem:[%s2298_s1 + $0xb8] sm:$0xff]  ;;  %v45_v24 = vld [vmem:[%s2298_s1 + $0xd0] sm:$0xff]  ;;  %v44_v25 = vld [vmem:[%s2298_s1 + $0xc8] sm:$0xff] }
  0x16   :  { %153 = vadd.xlane.f32.xlu1 %v152_v28  ;;  %150 = vadd.xlane.f32.xlu0 %v149_v29  ;;  %v1565_v55 = vsel %vm136_vm0, %v114_v51, 0.0  ;;  %v176_v63 = vsel %vm136_vm0, %v107_v58, 0.0  ;;  %v109_v2 = vmul.f32 %v1490_v13, %v34_v60  ;;  %v108_v4 = vmul.f32 %v1490_v13, %v33_v61  ;;  %v47_v30 = vld [vmem:[%s2298_s1 + $0xe0] sm:$0xff]  ;;  %v46_v31 = vld [vmem:[%s2298_s1 + $0xd8] sm:$0xff]  ;;  %v49_v36 = vld [vmem:[%s2298_s1 + $0xf0] sm:$0xff] }
  0x17   :  { %v173_v1 = vsel %vm136_vm0, %v106_v59, 0.0  ;;  %v1590_v6 = vrot.slane %v83_v62, %v86_v7  ;;  %v111_v11 = vmul.f32 %v1490_v13, %v36_v5  ;;  %v110_v12 = vmul.f32 %v1490_v13, %v35_v8  ;;  %v43_v13 = vld [vmem:[%s2298_s1 + $0xc0] sm:$0xff]  ;;  %v48_v37 = vld [vmem:[%s2298_s1 + $0xe8] sm:$0xff]  ;;  %v50_v43 = vld [vmem:[%s2298_s1 + $0xf8] sm:$0xff] }
  0x18   :  { %v182_v9 = vsel %vm136_vm0, %v109_v2, 0.0  ;;  %v179_v10 = vsel %vm136_vm0, %v108_v4, 0.0  ;;  %v51_v42 = vld [vmem:[%s2298_s1 + $0x100] sm:$0xff]  ;;  %v56_v48 = vld [vmem:[%s2298_s1 + $0x128] sm:$0xff]  ;;  %v58_v61 = vld [vmem:[%s2298_s1 + $0x138] sm:$0xff]  ;;  %vm983_vm3 = vcmask 195712  }
  0x19   :  { %v188_v7 = vsel %vm136_vm0, %v111_v11, 0.0  ;;  %v185_v16 = vsel %vm136_vm0, %v110_v12, 0.0  ;;  %v116_v17 = vmul.f32 %v1590_v6, %v41_v14  ;;  %v115_v18 = vmul.f32 %v1590_v6, %v40_v15  ;;  %v52_v49 = vld [vmem:[%s2298_s1 + $0x108] sm:$0xff]  ;;  %v53_v62 = vld [vmem:[%s2298_s1 + $0x110] sm:$0xff]  ;;  %v54_v4 = vld [vmem:[%s2298_s1 + $0x118] sm:$0xff] }
  0x1a   :  { %159 = vadd.xlane.f32.xlu1 %v158_v34  ;;  %156 = vadd.xlane.f32.xlu0 %v155_v35  ;;  %v118_v22 = vmul.f32 %v1590_v6, %v43_v13  ;;  %v117_v23 = vmul.f32 %v1590_v6, %v42_v19  ;;  %v120_v28 = vmul.f32 %v1590_v6, %v45_v24  ;;  %v55_v14 = vld [vmem:[%s2298_s1 + $0x120] sm:$0xff]  ;;  %v1707_v13 = vand.u32 127, %v73_v0 }
  0x1b   :  { %v203_v20 = vsel %vm136_vm0, %v116_v17, 0.0  ;;  %v200_v21 = vsel %vm136_vm0, %v115_v18, 0.0  ;;  %v119_v29 = vmul.f32 %v1590_v6, %v44_v25  ;;  %v122_v34 = vmul.f32 %v1590_v6, %v47_v30 }
  0x1c   :  { %v209_v26 = vsel %vm136_vm0, %v118_v22, 0.0  ;;  %v206_v27 = vsel %vm136_vm0, %v117_v23, 0.0  ;;  %v215_v32 = vsel %vm136_vm0, %v120_v28, 0.0  ;;  %v121_v35 = vmul.f32 %v1590_v6, %v46_v31  ;;  %2311 = vst [vmem:[#allocation6_spill] sm:$0xff] %v1707_v13 }
  0x1d   :  { %v212_v33 = vsel %vm136_vm0, %v119_v29, 0.0  ;;  %v221_v38 = vsel %vm136_vm0, %v122_v34, 0.0  ;;  %v124_v40 = vmul.f32 %v1590_v6, %v49_v36  ;;  %v123_v41 = vmul.f32 %v1590_v6, %v48_v37 }
  0x1e   :  { %165 = vadd.xlane.f32.xlu1 %v164_v44  ;;  %162 = vadd.xlane.f32.xlu0 %v161_v45  ;;  %v218_v39 = vsel %vm136_vm0, %v121_v35, 0.0  ;;  %v126_v46 = vmul.f32 %v1590_v6, %v51_v42  ;;  %v125_v47 = vmul.f32 %v1590_v6, %v50_v43  ;;  %v131_v53 = vmul.f32 %v1590_v6, %v56_v48 }
  0x1f   :  { %v227_v44 = vsel %vm136_vm0, %v124_v40, 0.0  ;;  %v224_v45 = vsel %vm136_vm0, %v123_v41, 0.0  ;;  %v128_v2 = vmul.f32 %v1590_v6, %v53_v62  ;;  %vm270_vm1 = vcmp.lt.s32.totalorder %v1707_v13, 8 }
  0x20   :  { %v233_v50 = vsel %vm136_vm0, %v126_v46, 0.0  ;;  %v230_v51 = vsel %vm136_vm0, %v125_v47, 0.0  ;;  %v248_v58 = vsel %vm136_vm0, %v131_v53, 0.0  ;;  %v1444_v29 = vmov 0  }
  0x21   :  { %v239_v8 = vsel %vm136_vm0, %v128_v2, 0.0  ;;  %1249 = vset.pattern.permute.xlu0 %v1444_v29  ;;  %1248 = vset.pattern.permute.xlu1 %v1444_v29  ;;  %vm990_vm4 = vcmask 261312   ;;  %vm997_vm5 = vcmask 326912   ;;  %vm1004_vm6 = vcmask 392512  }
  0x22   :  { %171 = vadd.xlane.f32.xlu1 %v170_v56  ;;  %168 = vadd.xlane.f32.xlu0 %v167_v57  ;;  %v127_v56 = vmul.f32 %v1590_v6, %v52_v49  ;;  %v57_v57 = vld [vmem:[%s2298_s1 + $0x130] sm:$0xff]  ;;  %vm1011_vm7 = vcmask 458112   ;;  %vm1018_vm8 = vcmask 523712   ;;  %vm1025_vm9 = vcmask 589312  }
  0x23   :  { %v132_v60 = vmul.f32 %v1590_v6, %v57_v57  ;;  %vm1032_vm10 = vcmask 654912   ;;  %vm1039_vm11 = vcmask 720512   ;;  %vm1046_vm12 = vcmask 786112  }
  0x24   :  { %v236_v59 = vsel %vm136_vm0, %v127_v56, 0.0  ;;  %vm1053_vm13 = vcmask 851712   ;;  %vm1060_vm14 = vcmask 917312   ;;  %vm1067_vm15 = vcmask 982912  }
  0x26   :  { %177 = vadd.xlane.f32.xlu1 %v176_v63  ;;  %174 = vadd.xlane.f32.xlu0 %v173_v1  ;;  %v251_v63 = vsel %vm136_vm0, %v132_v60, 0.0  ;;  %v133_v1 = vmul.f32 %v1590_v6, %v58_v61 }
  0x28   :  { %v254_v5 = vsel %vm136_vm0, %v133_v1, 0.0 }
  0x2a   :  { %183 = vadd.xlane.f32.xlu1 %v182_v9  ;;  %180 = vadd.xlane.f32.xlu0 %v179_v10  ;;  %v129_v9 = vmul.f32 %v1590_v6, %v54_v4  ;;  %v59_v10 = vld [vmem:[%s2298_s1 + $0x140] sm:$0xff] }
  0x2b   :  { %v134_v12 = vmul.f32 %v1590_v6, %v59_v10 }
  0x2c   :  { %v242_v11 = vsel %vm136_vm0, %v129_v9, 0.0 }
  0x2d   :  { %v257_v15 = vsel %vm136_vm0, %v134_v12, 0.0 }
  0x2e   :  { %189 = vadd.xlane.f32.xlu1 %v188_v7  ;;  %186 = vadd.xlane.f32.xlu0 %v185_v16  ;;  %v130_v16 = vmul.f32 %v1590_v6, %v55_v14 }
  0x30   :  { %v245_v18 = vsel %vm136_vm0, %v130_v16, 0.0 }
  0x32   :  { %204 = vadd.xlane.f32.xlu1 %v203_v20  ;;  %201 = vadd.xlane.f32.xlu0 %v200_v21 }
  0x36   :  { %210 = vadd.xlane.f32.xlu1 %v209_v26  ;;  %207 = vadd.xlane.f32.xlu0 %v206_v27 }
  0x3a   :  { %216 = vadd.xlane.f32.xlu1 %v215_v32  ;;  %213 = vadd.xlane.f32.xlu0 %v212_v33 }
  0x3e   :  { %222 = vadd.xlane.f32.xlu1 %v221_v38  ;;  %219 = vadd.xlane.f32.xlu0 %v218_v39 }
  0x42   :  { %228 = vadd.xlane.f32.xlu1 %v227_v44  ;;  %225 = vadd.xlane.f32.xlu0 %v224_v45 }
  0x46   :  { %234 = vadd.xlane.f32.xlu1 %v233_v50  ;;  %231 = vadd.xlane.f32.xlu0 %v230_v51 }
  0x4a   :  { %249 = vadd.xlane.f32.xlu1 %v248_v58  ;;  %237 = vadd.xlane.f32.xlu0 %v236_v59 }
  0x4e   :  { %192 = vadd.xlane.f32.xlu1 %v1557_v52  ;;  %252 = vadd.xlane.f32.xlu0 %v251_v63  ;;  %v60_v52 = vld [vmem:[%s2298_s1 + $0x148] sm:$0xff]  ;;  %s1446_s1 = smov [#allocation2]  }
  0x4f   :  { %v135_v7 = vmul.f32 %v1590_v6, %v60_v52  ;;  %s1234_s8 = sshll.u32 %s1446_s1, 4  ;;  %s1235_s8 = int_to_ptr.vmem [resolvable:$true] %s1234_s8 }
  0x50   :  { %s1418_s9 = scalar_lea.vmem %s1235_s8, 16  ;;  %s1422_s10 = scalar_lea.vmem %s1235_s8, 32 }
  0x51   :  { %v260_v17 = vsel %vm136_vm0, %v135_v7, 0.0  ;;  %vm1074_vm0 = vcmask 1048512   ;;  %p1419_p0 = scmp.ne.s32.totalorder %s1235_s8, %s1418_s9  ;;  %p1423_p1 = scmp.lt.s32.totalorder %s1235_s8, %s1235_s8 }
  0x52   :  { %255 = vadd.xlane.f32.xlu1 %v254_v5  ;;  %240 = vadd.xlane.f32.xlu0 %v239_v8  ;;  %p1424_p2 = scmp.lt.s32.totalorder %s1422_s10, %s1418_s9 }
  0x54   :  { %p1425_p3 = por %p1424_p2, %p1423_p1 }
  0x56   :  { %243 = vadd.xlane.f32.xlu1 %v242_v11  ;;  %195 = vadd.xlane.f32.xlu0 %v1562_v54  ;;  %v1443_v54 = vmov -1.0   ;;  %p1426_p4 = pnand %p1425_p3, %p1419_p0 }
  0x57   :  { %v272_v19 = vsel %vm270_vm1, 1.0, %v1443_v54  ;;  %vm1203_vm1 = vcmask 1041409  }
  0x5a   :  { %198 = vadd.xlane.f32.xlu1 %v1565_v55  ;;  %258 = vadd.xlane.f32.xlu0 %v257_v15 }
  0x5e   :  { %261 = vadd.xlane.f32.xlu1 %v260_v17  ;;  %246 = vadd.xlane.f32.xlu0 %v245_v18 }
  0x6f   :  { %281 = vbcast.lane.b32.xlu1 %v272_v19, 264 }
  0x73   :  { %285 = vbcast.lane.b32.xlu1 %v272_v19, 272 }
  0x74   :  { %277 = vbcast.lane.b32.xlu0 %v272_v19, 256 }
  0x77   :  { %289 = vbcast.lane.b32.xlu1 %v272_v19, 280 }
  0x78   :  { %293 = vbcast.lane.b32.xlu0 %v272_v19, 288 }
  0x7b   :  { %297 = vbcast.lane.b32.xlu1 %v272_v19, 296 }
  0x7c   :  { %301 = vbcast.lane.b32.xlu0 %v272_v19, 304 }
  0x7f   :  { %305 = vbcast.lane.b32.xlu1 %v272_v19, 312 }
  0x80   :  { %309 = vbcast.lane.b32.xlu0 %v272_v19, 320 }
  0x83   :  { %313 = vbcast.lane.b32.xlu1 %v272_v19, 328 }
  0x84   :  { %317 = vbcast.lane.b32.xlu0 %v272_v19, 336 }
  0x87   :  { %321 = vbcast.lane.b32.xlu1 %v272_v19, 344 }
  0x88   :  { %325 = vbcast.lane.b32.xlu0 %v272_v19, 352 }
  0x8b   :  { %340 = vbcast.lane.b32.xlu1 %v1443_v54, 256 }
  0x8c   :  { %344 = vbcast.lane.b32.xlu0 %v1443_v54, 264 }
  0x8f   :  { %329 = vbcast.lane.b32.xlu1 %v272_v19, 360 }
  0x90   :  { %348 = vbcast.lane.b32.xlu0 %v1443_v54, 272 }
  0x93   :  { %333 = vbcast.lane.b32.xlu1 %v272_v19, 368 }
  0x94   :  { %352 = vbcast.lane.b32.xlu0 %v1443_v54, 280 }
  0x97   :  { %337 = vbcast.lane.b32.xlu1 %v272_v19, 376 }
  0x98   :  { %356 = vbcast.lane.b32.xlu0 %v1443_v54, 288 }
  0x9b   :  { %v145_v0 = vpop.xlane.xlu1 %144  ;;  %v139_v55 = vpop.xlane.xlu0 %138 }
  0x9f   :  { %v1710_v6 = vpop.xlane.xlu1 %147  ;;  %v142_v20 = vpop.xlane.xlu0 %141 }
  0xa3   :  { %v1712_v21 = vpop.xlane.xlu1 %153  ;;  %v151_v22 = vpop.xlane.xlu0 %150 }
  0xa7   :  { %v1714_v23 = vpop.xlane.xlu1 %159  ;;  %v1716_v24 = vpop.xlane.xlu0 %156 }
  0xab   :  { %v1718_v25 = vpop.xlane.xlu1 %165  ;;  %v1720_v26 = vpop.xlane.xlu0 %162 }
  0xaf   :  { %v1722_v27 = vpop.xlane.xlu1 %171  ;;  %v1724_v28 = vpop.xlane.xlu0 %168 }
  0xb3   :  { %v1726_v30 = vpop.xlane.xlu1 %177  ;;  %v1728_v31 = vpop.xlane.xlu0 %174 }
  0xb7   :  { %v1730_v32 = vpop.xlane.xlu1 %183  ;;  %v1732_v33 = vpop.xlane.xlu0 %180 }
  0xbb   :  { %v1734_v34 = vpop.xlane.xlu1 %189  ;;  %v1736_v35 = vpop.xlane.xlu0 %186 }
  0xbf   :  { %v205_v36 = vpop.xlane.xlu1 %204  ;;  %v202_v37 = vpop.xlane.xlu0 %201 }
  0xc3   :  { %v211_v38 = vpop.xlane.xlu1 %210  ;;  %v208_v39 = vpop.xlane.xlu0 %207 }
  0xc7   :  { %v1738_v40 = vpop.xlane.xlu1 %216  ;;  %v214_v41 = vpop.xlane.xlu0 %213 }
  0xcb   :  { %v1740_v42 = vpop.xlane.xlu1 %222  ;;  %v1742_v43 = vpop.xlane.xlu0 %219 }
  0xcf   :  { %v1744_v44 = vpop.xlane.xlu1 %228  ;;  %v1746_v45 = vpop.xlane.xlu0 %225 }
  0xd3   :  { %v1748_v46 = vpop.xlane.xlu1 %234  ;;  %v1750_v47 = vpop.xlane.xlu0 %231 }
  0xd7   :  { %v1752_v48 = vpop.xlane.xlu1 %249  ;;  %v1754_v49 = vpop.xlane.xlu0 %237 }
  0xdb   :  { %v1756_v50 = vpop.xlane.xlu1 %192  ;;  %v1758_v51 = vpop.xlane.xlu0 %252 }
  0xdf   :  { %v1760_v53 = vpop.xlane.xlu1 %255  ;;  %v1762_v56 = vpop.xlane.xlu0 %240 }
  0xe3   :  { %v1764_v57 = vpop.xlane.xlu1 %243  ;;  %v1766_v58 = vpop.xlane.xlu0 %195 }
  0xe7   :  { %v1768_v59 = vpop.xlane.xlu1 %198  ;;  %v1770_v60 = vpop.xlane.xlu0 %258 }
  0xe8   :  { %2312 = vst [vmem:[#allocation7_spill] sm:$0xff] %v1768_v59  ;;  %2313 = vst [vmem:[#allocation8_spill] sm:$0xff] %v1770_v60 }
  0xeb   :  { %v1772_v61 = vpop.xlane.xlu1 %261  ;;  %v1774_v62 = vpop.xlane.xlu0 %246 }
  0xec   :  { %2314 = vst [vmem:[#allocation9_spill] sm:$0xff] %v1772_v61 }
  0xef   :  { %v282_v63 = vpop.permute.xlu1 %281  ;;  %v278_v2 = vpop.permute.xlu0 %277 }
  0xf0   :  { %v1776_v1 = vmul.f32 %v282_v63, %v142_v20  ;;  %v1778_v4 = vmul.f32 %v282_v63, %v205_v36  ;;  %v1780_v8 = vmul.f32 %v278_v2, %v139_v55  ;;  %v1784_v11 = vmul.f32 %v278_v2, %v202_v37 }
  0xf2   :  { %v464_v9 = vand.u32 2147483647, %v1776_v1  ;;  %v485_v10 = vand.u32 2147483647, %v1778_v4  ;;  %v463_v14 = vand.u32 2147483647, %v1780_v8 }
  0xf3   :  { %v286_v5 = vpop.permute.xlu1 %285  ;;  %v294_v52 = vpop.permute.xlu0 %293  ;;  %v484_v18 = vand.u32 2147483647, %v1784_v11 }
  0xf4   :  { %v1786_v12 = vmul.f32 %v286_v5, %v145_v0  ;;  %v506_v15 = vsub.f32 0.0, %v464_v9  ;;  %v1789_v7 = vmul.f32 %v286_v5, %v208_v39  ;;  %v527_v17 = vsub.f32 0.0, %v485_v10 }
  0xf5   :  { %v1792_v54 = vmul.f32 %v294_v52, %v151_v22  ;;  %v1795_v55 = vmul.f32 %v294_v52, %v214_v41  ;;  %v505_v20 = vsub.f32 0.0, %v463_v14  ;;  %v526_v39 = vsub.f32 0.0, %v484_v18 }
  0xf6   :  { %v465_v19 = vand.u32 2147483647, %v1786_v12  ;;  %v549_v29 = vmul.f32 1.442695, %v506_v15  ;;  %v486_v36 = vand.u32 2147483647, %v1789_v7 }
  0xf7   :  { %v290_v16 = vpop.permute.xlu1 %289  ;;  %v591_v37 = vmul.f32 1.442695, %v527_v17  ;;  %v467_v63 = vand.u32 2147483647, %v1792_v54  ;;  %v488_v5 = vand.u32 2147483647, %v1795_v55  ;;  %v302_v52 = vpop.permute.xlu0 %301 }
  0xf8   :  { %v1798_v0 = vmul.f32 %v290_v16, %v1710_v6  ;;  %v507_v2 = vsub.f32 0.0, %v465_v19  ;;  %v547_v22 = vmul.f32 1.442695, %v505_v20  ;;  %v1803_v9 = vmul.f32 %v290_v16, %v211_v38 }
  0xf9   :  { %1250 = vpow2.f32 %v549_v29  ;;  %v528_v10 = vsub.f32 0.0, %v486_v36  ;;  %v589_v6 = vmul.f32 1.442695, %v526_v39  ;;  %v509_v14 = vsub.f32 0.0, %v467_v63 }
  0xfa   :  { %v466_v41 = vand.u32 2147483647, %v1798_v0  ;;  %1252 = vpow2.f32 %v591_v37  ;;  %v551_v15 = vmul.f32 1.442695, %v507_v2  ;;  %v530_v3 = vsub.f32 0.0, %v488_v5 }
  0xfb   :  { %v298_v17 = vpop.permute.xlu1 %297  ;;  %1254 = vpow2.f32 %v547_v22  ;;  %v487_v18 = vand.u32 2147483647, %v1803_v9  ;;  %v1808_v13 = vmul.f32 %v302_v52, %v1716_v24  ;;  %v593_v38 = vmul.f32 1.442695, %v528_v10  ;;  %v310_v10 = vpop.permute.xlu0 %309 }
  0xfc   :  { %v508_v19 = vsub.f32 0.0, %v466_v41  ;;  %1256 = vpow2.f32 %v589_v6  ;;  %v555_v16 = vmul.f32 1.442695, %v509_v14  ;;  %v1811_v20 = vmul.f32 %v298_v17, %v1712_v21 }
  0xfd   :  { %1258 = vpow2.f32 %v551_v15  ;;  %v597_v29 = vmul.f32 1.442695, %v530_v3  ;;  %v529_v36 = vsub.f32 0.0, %v487_v18  ;;  %v1814_v39 = vmul.f32 %v302_v52, %v1742_v43 }
  0xfe   :  { %v553_v37 = vmul.f32 1.442695, %v508_v19  ;;  %v469_v63 = vand.u32 2147483647, %v1808_v13  ;;  %1260 = vpow2.f32 %v593_v38  ;;  %v468_v24 = vand.u32 2147483647, %v1811_v20 }
  0xff   :  { %2315 = vst [vmem:[#allocation10_spill] sm:$0xff] %v1814_v39  ;;  %1262 = vpow2.f32 %v555_v16  ;;  %v306_v5 = vpop.permute.xlu1 %305  ;;  %v595_v21 = vmul.f32 1.442695, %v529_v36  ;;  %v490_v41 = vand.u32 2147483647, %v1814_v39  ;;  %v1828_v36 = vmul.f32 %v298_v17, %v1738_v40 }
 0x100   :  { %1264 = vpow2.f32 %v597_v29  ;;  %v511_v3 = vsub.f32 0.0, %v469_v63  ;;  %v510_v19 = vsub.f32 0.0, %v468_v24  ;;  %v1824_v38 = vmul.f32 %v306_v5, %v1714_v23 }
 0x101   :  { %1266 = vpow2.f32 %v553_v37  ;;  %v1831_v37 = vmul.f32 %v310_v10, %v1720_v26  ;;  %v1837_v29 = vmul.f32 %v310_v10, %v1746_v45  ;;  %v1845_v10 = vmul.f32 %v306_v5, %v1740_v42 }
 0x102   :  { %1268 = vpow2.f32 %v595_v21  ;;  %v559_v52 = vmul.f32 1.442695, %v511_v3  ;;  %v557_v26 = vmul.f32 1.442695, %v510_v19  ;;  %v470_v17 = vand.u32 2147483647, %v1824_v38 }
 0x103   :  { %v1251_v2 = vpop.eup %1250  ;;  %2316 = vst [vmem:[#allocation11_spill] sm:$0xff] %v1837_v29  ;;  %v471_v3 = vand.u32 2147483647, %v1831_v37  ;;  %v314_v43 = vpop.permute.xlu1 %313  ;;  %v491_v5 = vand.u32 2147483647, %v1845_v10 }
 0x104   :  { %v1253_v22 = vpop.eup %1252  ;;  %v632_v15 = vadd.f32 1.0, %v1251_v2  ;;  %v532_v2 = vsub.f32 0.0, %v490_v41  ;;  %v489_v41 = vand.u32 2147483647, %v1828_v36  ;;  %v512_v59 = vsub.f32 0.0, %v470_v17 }
 0x105   :  { %v1255_v14 = vpop.eup %1254  ;;  %v653_v16 = vadd.f32 1.0, %v1253_v22  ;;  %v1850_v60 = vmul.f32 %v314_v43, %v1718_v25  ;;  %v513_v22 = vsub.f32 0.0, %v471_v3 }
 0x106   :  { %v1257_v63 = vpop.eup %1256  ;;  %v631_v24 = vadd.f32 1.0, %v1255_v14  ;;  %1270 = vlog2.f32 %v632_v15  ;;  %v318_v14 = vpop.permute.xlu0 %317  ;;  %v601_v45 = vmul.f32 1.442695, %v532_v2  ;;  %v531_v2 = vsub.f32 0.0, %v489_v41 }
 0x107   :  { %v1259_v18 = vpop.eup %1258  ;;  %1272 = vlog2.f32 %v653_v16  ;;  %v652_v21 = vadd.f32 1.0, %v1257_v63  ;;  %v492_v63 = vand.u32 2147483647, %v1837_v29  ;;  %v472_v41 = vand.u32 2147483647, %v1850_v60 }
 0x108   :  { %v1261_v6 = vpop.eup %1260  ;;  %1274 = vpow2.f32 %v559_v52  ;;  %v633_v19 = vadd.f32 1.0, %v1259_v18  ;;  %v1854_v18 = vmul.f32 %v318_v14, %v1724_v28  ;;  %v599_v3 = vmul.f32 1.442695, %v531_v2 }
 0x109   :  { %v1263_v23 = vpop.eup %1262  ;;  %1276 = vlog2.f32 %v631_v24  ;;  %v654_v61 = vadd.f32 1.0, %v1261_v6  ;;  %v1862_v28 = vmul.f32 %v314_v43, %v1744_v44  ;;  %v514_v43 = vsub.f32 0.0, %v472_v41 }
 0x10a   :  { %v1265_v15 = vpop.eup %1264  ;;  %1278 = vpow2.f32 %v557_v26  ;;  %v635_v52 = vadd.f32 1.0, %v1263_v23  ;;  %v1858_v26 = vmul.f32 %v318_v14, %v1750_v47  ;;  %v326_v25 = vpop.permute.xlu0 %325  ;;  %v534_v23 = vsub.f32 0.0, %v492_v63 }
 0x10b   :  { %v1267_v40 = vpop.eup %1266  ;;  %1280 = vlog2.f32 %v652_v21  ;;  %v656_v42 = vadd.f32 1.0, %v1265_v15  ;;  %v561_v21 = vmul.f32 1.442695, %v512_v59  ;;  %2318 = vst [vmem:[#allocation13_spill] sm:$0xff] %v1862_v28  ;;  %v322_v15 = vpop.permute.xlu1 %321  ;;  %v473_v47 = vand.u32 2147483647, %v1854_v18 }
 0x10c   :  { %1282 = vpow2.f32 %v601_v45  ;;  %v634_v24 = vadd.f32 1.0, %v1267_v40  ;;  %2317 = vst [vmem:[#allocation12_spill] sm:$0xff] %v1858_v26  ;;  %v1269_v17 = vpop.eup %1268  ;;  %v563_v45 = vmul.f32 1.442695, %v513_v22  ;;  %v1866_v14 = vmul.f32 %v326_v25, %v1728_v31 }
 0x10d   :  { %1284 = vlog2.f32 %v633_v19  ;;  %v533_v19 = vsub.f32 0.0, %v491_v5  ;;  %v655_v59 = vadd.f32 1.0, %v1269_v17  ;;  %v494_v22 = vand.u32 2147483647, %v1858_v26 }
 0x10e   :  { %1286 = vlog2.f32 %v654_v61  ;;  %2319 = vst [vmem:[#allocation14_spill] sm:$0xff] %v1866_v14  ;;  %v605_v44 = vmul.f32 1.442695, %v534_v23  ;;  %v1873_v2 = vmul.f32 %v322_v15, %v1722_v27  ;;  %v493_v31 = vand.u32 2147483647, %v1862_v28 }
 0x10f   :  { %1288 = vlog2.f32 %v635_v52  ;;  %v1878_v17 = vmul.f32 %v326_v25, %v1754_v49  ;;  %v603_v6 = vmul.f32 1.442695, %v533_v19  ;;  %v515_v16 = vsub.f32 0.0, %v473_v47  ;;  %v1886_v47 = vpop.permute.xlu0 %344 }
 0x110   :  { %v1271_v40 = vpop.eup %1270  ;;  %1290 = vlog2.f32 %v656_v42  ;;  %v475_v23 = vand.u32 2147483647, %v1866_v14  ;;  %v536_v63 = vsub.f32 0.0, %v494_v22  ;;  %v474_v26 = vand.u32 2147483647, %v1873_v2 }
 0x111   :  { %v1868_v61 = vpop.eup %1272  ;;  %1292 = vlog2.f32 %v634_v24  ;;  %2320 = vst [vmem:[#allocation15_spill] sm:$0xff] %v1878_v17  ;;  %v676_v49 = vmul.f32 0.6931472, %v1271_v40  ;;  %v496_v19 = vand.u32 2147483647, %v1878_v17  ;;  %v1900_v17 = vmul.f32 %v1886_v47, %v1734_v34 }
 0x112   :  { %v1275_v52 = vpop.eup %1274  ;;  %1294 = vpow2.f32 %v561_v21  ;;  %v567_v22 = vmul.f32 1.442695, %v515_v16  ;;  %v609_v40 = vmul.f32 1.442695, %v536_v63  ;;  %v2321_v16 = vmin.f32 %v1776_v1, 0.0 }
 0x113   :  { %v1277_v42 = vpop.eup %1276  ;;  %1296 = vpow2.f32 %v599_v3  ;;  %v637_v27 = vadd.f32 1.0, %v1275_v52  ;;  %v565_v3 = vmul.f32 1.442695, %v514_v43  ;;  %v517_v52 = vsub.f32 0.0, %v475_v23 }
 0x114   :  { %v1279_v24 = vpop.eup %1278  ;;  %1298 = vpow2.f32 %v563_v45  ;;  %v535_v45 = vsub.f32 0.0, %v493_v31  ;;  %v674_v14 = vmul.f32 0.6931472, %v1277_v42  ;;  %v341_v31 = vpop.permute.xlu1 %340  ;;  %v516_v42 = vsub.f32 0.0, %v474_v26 }
 0x115   :  { %v1881_v21 = vpop.eup %1280  ;;  %1300 = vlog2.f32 %v655_v59  ;;  %v636_v28 = vadd.f32 1.0, %v1279_v24  ;;  %v1894_v24 = vmul.f32 %v322_v15, %v1748_v46  ;;  %v2322_v63 = vmin.f32 %v1780_v8, 0.0 }
 0x116   :  { %v1283_v5 = vpop.eup %1282  ;;  %1302 = vpow2.f32 %v605_v44  ;;  %v428_v59 = vmin.f32 %v1824_v38, 0.0  ;;  %v571_v26 = vmul.f32 1.442695, %v517_v52  ;;  %v569_v8 = vmul.f32 1.442695, %v516_v42 }
 0x117   :  { %v1285_v25 = vpop.eup %1284  ;;  %1304 = vpow2.f32 %v603_v6  ;;  %v658_v43 = vadd.f32 1.0, %v1283_v5  ;;  %v758_v6 = vsub.f32 %v2321_v16, %v676_v49  ;;  %v607_v5 = vmul.f32 1.442695, %v535_v45 }
 0x118   :  { %v1888_v39 = vpop.eup %1286  ;;  %1306 = vlog2.f32 %v637_v27  ;;  %v538_v27 = vsub.f32 0.0, %v496_v19  ;;  %v757_v46 = vsub.f32 %v2322_v63, %v674_v14  ;;  %v495_v1 = vand.u32 2147483647, %v1894_v24 }
 0x119   :  { %v1891_v44 = vpop.eup %1288  ;;  %1308 = vpow2.f32 %v565_v3  ;;  %845 = vperm.xlu0 %1249, %v758_v6   ;;  %v480_v14 = vand.u32 2147483647, %v1900_v17  ;;  %v1912_v45 = vmul.f32 %v341_v31, %v1752_v48  ;;  %v716_v29 = vmul.f32 0.6931472, %v1881_v21 }
 0x11a   :  { %v1896_v41 = vpop.eup %1290  ;;  %1310 = vlog2.f32 %v636_v28  ;;  %842 = vperm.xlu1 %1248, %v757_v46   ;;  %v678_v28 = vmul.f32 0.6931472, %v1285_v25  ;;  %v613_v16 = vmul.f32 1.442695, %v538_v27  ;;  %v1918_v25 = vmul.f32 %v341_v31, %v1736_v35 }
 0x11b   :  { %v1293_v23 = vpop.eup %1292  ;;  %1312 = vpow2.f32 %v567_v22  ;;  %v537_v48 = vsub.f32 0.0, %v495_v1  ;;  %v522_v52 = vsub.f32 0.0, %v480_v14  ;;  %v1932_v21 = vmul.f32 %v1886_v47, %v1758_v51 }
 0x11c   :  { %v1295_v15 = vpop.eup %1294  ;;  %1314 = vpow2.f32 %v609_v40  ;;  %v330_v40 = vpop.permute.xlu1 %329  ;;  %v680_v3 = vmul.f32 0.6931472, %v1293_v23  ;;  %v479_v23 = vand.u32 2147483647, %v1918_v25 }
 0x11d   :  { %v1297_v34 = vpop.eup %1296  ;;  %1316 = vlog2.f32 %v658_v43  ;;  %v638_v22 = vadd.f32 1.0, %v1295_v15  ;;  %v2323_v43 = vmin.f32 %v1786_v12, 0.0  ;;  %v1925_v27 = vmul.f32 %v330_v40, %v1726_v30 }
 0x11e   :  { %v1299_v49 = vpop.eup %1298  ;;  %1318 = vpow2.f32 %v607_v5  ;;  %v657_v63 = vadd.f32 1.0, %v1297_v34  ;;  %v500_v5 = vand.u32 2147483647, %v1912_v45  ;;  %v2324_v12 = vmin.f32 %v1784_v11, 0.0 }
 0x11f   :  { %v1914_v19 = vpop.eup %1300  ;;  %1320 = vpow2.f32 %v571_v26  ;;  %v759_v42 = vsub.f32 %v2323_v43, %v678_v28  ;;  %v639_v46 = vadd.f32 1.0, %v1299_v49  ;;  %v718_v34 = vmul.f32 0.6931472, %v1868_v61 }
 0x120   :  { %v1303_v6 = vpop.eup %1302  ;;  %1322 = vpow2.f32 %v569_v8  ;;  %v778_v31 = vsub.f32 %v2324_v12, %v716_v29  ;;  %v2325_v30 = vmin.f32 %v1798_v0, 0.0  ;;  %v611_v14 = vmul.f32 1.442695, %v537_v48 }
 0x121   :  { %v1305_v15 = vpop.eup %1304  ;;  %848 = vperm.xlu0 %1249, %v759_v42   ;;  %v660_v35 = vadd.f32 1.0, %v1303_v6  ;;  %1324 = vlog2.f32 %v638_v22  ;;  %v1938_v22 = vmul.f32 %v330_v40, %v1762_v56  ;;  %v682_v11 = vmul.f32 0.6931472, %v1891_v44  ;;  %v349_v42 = vpop.permute.xlu0 %348 }
 0x122   :  { %v1307_v26 = vpop.eup %1306  ;;  %1326 = vlog2.f32 %v657_v63  ;;  %v760_v28 = vsub.f32 %v2325_v30, %v680_v3  ;;  %v659_v8 = vadd.f32 1.0, %v1305_v15  ;;  %905 = vperm.xlu1 %1248, %v778_v31   ;;  %v581_v61 = vmul.f32 1.442695, %v522_v52  ;;  %v334_v3 = vpop.permute.xlu1 %333 }
 0x123   :  { %v1309_v1 = vpop.eup %1308  ;;  %1328 = vlog2.f32 %v639_v46  ;;  %v542_v6 = vsub.f32 0.0, %v500_v5  ;;  %v476_v51 = vand.u32 2147483647, %v1925_v27  ;;  %v2326_v63 = vmin.f32 %v1778_v4, 0.0 }
 0x124   :  { %v1311_v49 = vpop.eup %1310  ;;  %1330 = vlog2.f32 %v660_v35  ;;  %v640_v0 = vadd.f32 1.0, %v1309_v1  ;;  %v720_v56 = vmul.f32 0.6931472, %v1888_v39  ;;  %v521_v44 = vsub.f32 0.0, %v479_v23 }
 0x125   :  { %v1313_v29 = vpop.eup %1312  ;;  %851 = vperm.xlu0 %1249, %v760_v28   ;;  %v779_v43 = vsub.f32 %v2326_v63, %v718_v34  ;;  %1332 = vpow2.f32 %v613_v16  ;;  %v2327_v52 = vmin.f32 %v1792_v54, 0.0  ;;  %v684_v48 = vmul.f32 0.6931472, %v1311_v49 }
 0x126   :  { %v1315_v47 = vpop.eup %1314  ;;  %1334 = vlog2.f32 %v659_v8  ;;  %v641_v5 = vadd.f32 1.0, %v1313_v29  ;;  %v501_v35 = vand.u32 2147483647, %v1932_v21  ;;  %v497_v12 = vand.u32 2147483647, %v1938_v22 }
 0x127   :  { %v1945_v40 = vpop.eup %1316  ;;  %v761_v46 = vsub.f32 %v2327_v52, %v682_v11  ;;  %908 = vperm.xlu1 %1248, %v779_v43   ;;  %1336 = vpow2.f32 %v581_v61  ;;  %v621_v39 = vmul.f32 1.442695, %v542_v6  ;;  %v518_v31 = vsub.f32 0.0, %v476_v51  ;;  %v338_v51 = vpop.permute.xlu1 %337 }
 0x128   :  { %v1319_v15 = vpop.eup %1318  ;;  %v1952_v16 = vmul.f32 %v334_v3, %v1732_v33  ;;  %1338 = vlog2.f32 %v640_v0  ;;  %v1955_v54 = vmul.f32 %v349_v42, %v1756_v50  ;;  %v2328_v34 = vmin.f32 %v1789_v7, 0.0 }
 0x129   :  { %v1321_v4 = vpop.eup %1320  ;;  %854 = vperm.xlu0 %1249, %v761_v46   ;;  %v722_v23 = vmul.f32 0.6931472, %v1914_v19  ;;  %1340 = vpow2.f32 %v611_v14  ;;  %v579_v28 = vmul.f32 1.442695, %v521_v44  ;;  %v2329_v49 = vmin.f32 %v1811_v20, 0.0 }
 0x12a   :  { %v780_v1 = vsub.f32 %v2328_v34, %v720_v56  ;;  %v1323_v30 = vpop.eup %1322  ;;  %v686_v11 = vmul.f32 0.6931472, %v1307_v26  ;;  %v662_v33 = vadd.f32 1.0, %v1315_v47  ;;  %1342 = vlog2.f32 %v641_v5 }
 0x12b   :  { %v762_v8 = vsub.f32 %v2329_v49, %v684_v48  ;;  %v1325_v29 = vpop.eup %1324  ;;  %v1963_v61 = vmul.f32 %v349_v42, %v1760_v53  ;;  %v539_v50 = vsub.f32 0.0, %v497_v12  ;;  %1344 = vpow2.f32 %v621_v39 }
 0x12c   :  { %911 = vperm.xlu1 %1248, %v780_v1   ;;  %v1327_v6 = vpop.eup %1326  ;;  %v573_v7 = vmul.f32 1.442695, %v518_v31  ;;  %v1966_v19 = vmul.f32 %v334_v3, %v1764_v57  ;;  %v477_v14 = vand.u32 2147483647, %v1952_v16  ;;  %v642_v20 = vadd.f32 1.0, %v1323_v30 }
 0x12d   :  { %857 = vperm.xlu0 %1249, %v762_v8   ;;  %v481_v26 = vand.u32 2147483647, %v1955_v54  ;;  %v2330_v47 = vmin.f32 %v1803_v9, 0.0  ;;  %v724_v53 = vmul.f32 0.6931472, %v1896_v41  ;;  %v1329_v63 = vpop.eup %1328  ;;  %v661_v43 = vadd.f32 1.0, %v1319_v15  ;;  %v353_v9 = vpop.permute.xlu0 %352 }
 0x12e   :  { %1346 = vpow2.f32 %v579_v28  ;;  %v2331_v56 = vmin.f32 %v1808_v13, 0.0  ;;  %v688_v57 = vmul.f32 0.6931472, %v1325_v29  ;;  %v1975_v3 = vpop.eup %1330  ;;  %v543_v42 = vsub.f32 0.0, %v501_v35 }
 0x12f   :  { %v781_v0 = vsub.f32 %v2330_v47, %v722_v23  ;;  %1348 = vlog2.f32 %v662_v33  ;;  %v502_v52 = vand.u32 2147483647, %v1963_v61  ;;  %v615_v46 = vmul.f32 1.442695, %v539_v50  ;;  %v1978_v48 = vpop.eup %1332 }
 0x130   :  { %v763_v44 = vsub.f32 %v2331_v56, %v686_v11  ;;  %1350 = vpow2.f32 %v573_v7  ;;  %v498_v41 = vand.u32 2147483647, %v1966_v19  ;;  %v519_v15 = vsub.f32 0.0, %v477_v14  ;;  %v1335_v13 = vpop.eup %1334 }
 0x131   :  { %914 = vperm.xlu1 %1248, %v781_v0   ;;  %v1982_v5 = vmul.f32 %v338_v51, %v1730_v32  ;;  %v643_v12 = vadd.f32 1.0, %v1321_v4  ;;  %1352 = vlog2.f32 %v642_v20  ;;  %v2332_v35 = vmin.f32 %v1795_v55, 0.0  ;;  %v1337_v34 = vpop.eup %1336  ;;  %v2334_v20 = vld [vmem:[#allocation8_spill] sm:$0xff]  ;;  %v357_v56 = vpop.permute.xlu0 %356 }
 0x132   :  { %860 = vperm.xlu0 %1249, %v763_v44   ;;  %v726_v31 = vmul.f32 0.6931472, %v1327_v6  ;;  %1354 = vlog2.f32 %v661_v43  ;;  %v523_v1 = vsub.f32 0.0, %v481_v26  ;;  %v764_v23 = vsub.f32 %v428_v59, %v688_v57  ;;  %v1339_v28 = vpop.eup %1338 }
 0x133   :  { %v782_v39 = vsub.f32 %v2332_v35, %v724_v53  ;;  %v690_v30 = vmul.f32 0.6931472, %v1329_v63  ;;  %v623_v49 = vmul.f32 1.442695, %v543_v42  ;;  %v544_v8 = vsub.f32 0.0, %v502_v52  ;;  %v1341_v4 = vpop.eup %1340  ;;  %v2336_v42 = vld [vmem:[#allocation10_spill] sm:$0xff] }
 0x134   :  { %1356 = vpow2.f32 %v615_v46  ;;  %v1989_v32 = vmul.f32 %v353_v9, %v1766_v58  ;;  %v540_v11 = vsub.f32 0.0, %v498_v41  ;;  %v575_v55 = vmul.f32 1.442695, %v519_v15  ;;  %v1343_v38 = vpop.eup %1342 }
 0x135   :  { %917 = vperm.xlu1 %1248, %v782_v39   ;;  %v1992_v29 = vmul.f32 %v338_v51, %v1774_v62  ;;  %v478_v33 = vand.u32 2147483647, %v1982_v5  ;;  %1358 = vlog2.f32 %v643_v12  ;;  %v648_v59 = vadd.f32 1.0, %v1337_v34  ;;  %v1345_v58 = vpop.eup %1344 }
 0x136   :  { %863 = vperm.xlu0 %1249, %v764_v23   ;;  %v2333_v50 = vmin.f32 %v1828_v36, 0.0  ;;  %v728_v7 = vmul.f32 0.6931472, %v1945_v40  ;;  %v583_v14 = vmul.f32 1.442695, %v523_v1  ;;  %v1999_v26 = vmul.f32 %v353_v9, %v2334_v20  ;;  %v2339_v23 = vld [vmem:[#allocation7_spill] sm:$0xff] }
 0x137   :  { %v2335_v47 = vmin.f32 %v1831_v37, 0.0  ;;  %v692_v51 = vmul.f32 0.6931472, %v1339_v28  ;;  %v663_v0 = vadd.f32 1.0, %v1341_v4  ;;  %1360 = vpow2.f32 %v623_v49 }
 0x138   :  { %v783_v6 = vsub.f32 %v2333_v50, %v726_v31  ;;  %v625_v53 = vmul.f32 1.442695, %v544_v8  ;;  %v482_v63 = vand.u32 2147483647, %v1989_v32  ;;  %v1347_v43 = vpop.eup %1346  ;;  %1362 = vpow2.f32 %v575_v55 }
 0x139   :  { %v765_v62 = vsub.f32 %v2335_v47, %v690_v30  ;;  %v617_v36 = vmul.f32 1.442695, %v540_v11  ;;  %v499_v40 = vand.u32 2147483647, %v1992_v29  ;;  %v520_v44 = vsub.f32 0.0, %v478_v33  ;;  %v2005_v57 = vpop.eup %1348 }
 0x13a   :  { %920 = vperm.xlu1 %1248, %v783_v6   ;;  %1364 = vlog2.f32 %v648_v59  ;;  %v668_v37 = vadd.f32 1.0, %v1345_v58  ;;  %v2337_v52 = vmin.f32 %v2336_v42, 0.0  ;;  %v730_v9 = vmul.f32 0.6931472, %v1335_v13  ;;  %v1351_v41 = vpop.eup %1350  ;;  %v2342_v58 = vld [vmem:[#allocation9_spill] sm:$0xff] }
 0x13b   :  { %866 = vperm.xlu0 %1249, %v765_v62   ;;  %1366 = vpow2.f32 %v583_v14  ;;  %v503_v15 = vand.u32 2147483647, %v1999_v26  ;;  %v2338_v12 = vmin.f32 %v1850_v60, 0.0  ;;  %v694_v39 = vmul.f32 0.6931472, %v1343_v38  ;;  %v1353_v31 = vpop.eup %1352 }
 0x13c   :  { %v784_v46 = vsub.f32 %v2337_v52, %v728_v7  ;;  %1368 = vlog2.f32 %v663_v0  ;;  %v647_v34 = vadd.f32 1.0, %v1347_v43  ;;  %v524_v1 = vsub.f32 0.0, %v482_v63  ;;  %v1355_v28 = vpop.eup %1354  ;;  %v2345_v43 = vld [vmem:[#allocation13_spill] sm:$0xff] }
 0x13d   :  { %v766_v35 = vsub.f32 %v2338_v12, %v692_v51  ;;  %v2013_v30 = vmul.f32 %v357_v56, %v2339_v23  ;;  %v664_v49 = vadd.f32 1.0, %v1978_v48  ;;  %1370 = vpow2.f32 %v617_v36 }
 0x13e   :  { %923 = vperm.xlu1 %1248, %v784_v46   ;;  %v541_v13 = vsub.f32 0.0, %v499_v40  ;;  %v577_v8 = vmul.f32 1.442695, %v520_v44  ;;  %v1357_v4 = vpop.eup %1356  ;;  %1372 = vlog2.f32 %v668_v37  ;;  %v644_v60 = vadd.f32 1.0, %v1351_v41  ;;  %v2346_v46 = vld [vmem:[#allocation14_spill] sm:$0xff] }
 0x13f   :  { %869 = vperm.xlu0 %1249, %v766_v35   ;;  %v2340_v11 = vmin.f32 %v1845_v10, 0.0  ;;  %v732_v33 = vmul.f32 0.6931472, %v1975_v3  ;;  %1374 = vpow2.f32 %v625_v53  ;;  %v545_v38 = vsub.f32 0.0, %v503_v15  ;;  %v1359_v7 = vpop.eup %1358 }
 0x140   :  { %v2341_v59 = vmin.f32 %v1854_v18, 0.0  ;;  %v696_v6 = vmul.f32 0.6931472, %v1353_v31  ;;  %1376 = vlog2.f32 %v647_v34  ;;  %v585_v48 = vmul.f32 1.442695, %v524_v1  ;;  %v2343_v18 = vld [vmem:[#allocation11_spill] sm:$0xff] }
 0x141   :  { %v785_v55 = vsub.f32 %v2340_v11, %v730_v9  ;;  %v2022_v14 = vmul.f32 %v357_v56, %v2342_v58  ;;  %v483_v20 = vand.u32 2147483647, %v2013_v30  ;;  %v432_v10 = vmin.f32 %v1873_v2, 0.0  ;;  %v1361_v3 = vpop.eup %1360 }
 0x142   :  { %v767_v50 = vsub.f32 %v2341_v59, %v694_v39  ;;  %1378 = vpow2.f32 %v577_v8  ;;  %v619_v47 = vmul.f32 1.442695, %v541_v13  ;;  %v665_v62 = vadd.f32 1.0, %v1357_v4  ;;  %v1363_v63 = vpop.eup %1362 }
 0x143   :  { %926 = vperm.xlu1 %1248, %v785_v55   ;;  %1380 = vlog2.f32 %v644_v60  ;;  %v2344_v51 = vmin.f32 %v2343_v18, 0.0  ;;  %v734_v53 = vmul.f32 0.6931472, %v1355_v28  ;;  %v451_v36 = vmin.f32 %v2345_v43, 0.0  ;;  %v2347_v28 = vld [vmem:[#allocation12_spill] sm:$0xff] }
 0x144   :  { %872 = vperm.xlu0 %1249, %v767_v50   ;;  %1382 = vlog2.f32 %v664_v49  ;;  %v768_v56 = vsub.f32 %v432_v10, %v696_v6  ;;  %v698_v40 = vmul.f32 0.6931472, %v1359_v7  ;;  %v1365_v44 = vpop.eup %1364  ;;  %v627_v37 = vmul.f32 1.442695, %v545_v38 }
 0x145   :  { %v786_v0 = vsub.f32 %v2344_v51, %v732_v33  ;;  %1384 = vpow2.f32 %v585_v48  ;;  %v504_v2 = vand.u32 2147483647, %v2022_v14  ;;  %v525_v42 = vsub.f32 0.0, %v483_v20  ;;  %v1367_v52 = vpop.eup %1366 }
 0x146   :  { %v433_v9 = vmin.f32 %v2346_v46, 0.0  ;;  %v669_v41 = vadd.f32 1.0, %v1361_v3  ;;  %1386 = vpow2.f32 %v619_v47  ;;  %v1369_v15 = vpop.eup %1368  ;;  %v645_v12 = vadd.f32 1.0, %v1363_v63  ;;  %v2348_v46 = vld [vmem:[#allocation15_spill] sm:$0xff] }
 0x147   :  { %929 = vperm.xlu1 %1248, %v786_v0   ;;  %1388 = vlog2.f32 %v665_v62  ;;  %v787_v35 = vsub.f32 %v451_v36, %v734_v53  ;;  %v736_v39 = vmul.f32 0.6931472, %v2005_v57  ;;  %v1371_v31 = vpop.eup %1370  ;;  %v708_v1 = vmul.f32 0.6931472, %v1365_v44 }
 0x148   :  { %875 = vperm.xlu0 %1249, %v768_v56   ;;  %v769_v34 = vsub.f32 %v433_v9, %v698_v40  ;;  %v1373_v23 = vpop.eup %1372  ;;  %v452_v49 = vmin.f32 %v2347_v28, 0.0  ;;  %1390 = vpow2.f32 %v627_v37  ;;  %v546_v13 = vsub.f32 0.0, %v504_v2 }
 0x149   :  { %v587_v8 = vmul.f32 1.442695, %v525_v42  ;;  %v1375_v4 = vpop.eup %1374  ;;  %v438_v60 = vmin.f32 %v1900_v17, 0.0  ;;  %1392 = vlog2.f32 %v669_v41  ;;  %v649_v11 = vadd.f32 1.0, %v1367_v52 }
 0x14a   :  { %v1377_v55 = vpop.eup %1376  ;;  %v666_v33 = vadd.f32 1.0, %v1371_v31  ;;  %1394 = vlog2.f32 %v645_v12  ;;  %v788_v57 = vsub.f32 %v452_v49, %v736_v39  ;;  %v738_v38 = vmul.f32 0.6931472, %v1369_v15 }
 0x14b   :  { %932 = vperm.xlu1 %1248, %v787_v35   ;;  %v774_v50 = vsub.f32 %v438_v60, %v708_v1  ;;  %v748_v6 = vmul.f32 0.6931472, %v1373_v23  ;;  %v453_v48 = vmin.f32 %v1894_v24, 0.0  ;;  %1396 = vpow2.f32 %v587_v8 }
 0x14c   :  { %878 = vperm.xlu0 %1249, %v769_v34   ;;  %v1379_v59 = vpop.eup %1378  ;;  %v629_v58 = vmul.f32 1.442695, %v546_v13  ;;  %v458_v17 = vmin.f32 %v1912_v45, 0.0  ;;  %v670_v10 = vadd.f32 1.0, %v1375_v4  ;;  %1398 = vlog2.f32 %v649_v11 }
 0x14d   :  { %v1381_v7 = vpop.eup %1380  ;;  %1400 = vlog2.f32 %v666_v33  ;;  %v646_v3 = vadd.f32 1.0, %v1379_v59  ;;  %v789_v62 = vsub.f32 %v453_v48, %v738_v38  ;;  %v706_v18 = vmul.f32 0.6931472, %v1377_v55 }
 0x14e   :  { %v1383_v20 = vpop.eup %1382  ;;  %v794_v0 = vsub.f32 %v458_v17, %v748_v6  ;;  %v700_v53 = vmul.f32 0.6931472, %v1381_v7  ;;  %v437_v24 = vmin.f32 %v1918_v25, 0.0  ;;  %1402 = vpow2.f32 %v629_v58 }
 0x14f   :  { %935 = vperm.xlu1 %1248, %v788_v57   ;;  %v1385_v47 = vpop.eup %1384  ;;  %1404 = vlog2.f32 %v670_v10  ;;  %v434_v43 = vmin.f32 %v1925_v27, 0.0  ;;  %v740_v44 = vmul.f32 0.6931472, %v1383_v20  ;;  %v454_v9 = vmin.f32 %v2348_v46, 0.0 }
 0x150   :  { %893 = vperm.xlu0 %1249, %v774_v50   ;;  %v1387_v51 = vpop.eup %1386  ;;  %v650_v45 = vadd.f32 1.0, %v1385_v47  ;;  %1406 = vlog2.f32 %v646_v3  ;;  %v773_v40 = vsub.f32 %v437_v24, %v706_v18  ;;  %v455_v25 = vmin.f32 %v1938_v22, 0.0 }
 0x151   :  { %v1389_v63 = vpop.eup %1388  ;;  %v667_v56 = vadd.f32 1.0, %v1387_v51  ;;  %v770_v2 = vsub.f32 %v434_v43, %v700_v53  ;;  %v790_v15 = vsub.f32 %v454_v9, %v740_v44  ;;  %v459_v1 = vmin.f32 %v1932_v21, 0.0 }
 0x152   :  { %v1391_v36 = vpop.eup %1390  ;;  %v742_v42 = vmul.f32 0.6931472, %v1389_v63  ;;  %1408 = vlog2.f32 %v650_v45  ;;  %v435_v23 = vmin.f32 %v1952_v16, 0.0  ;;  %v439_v55 = vmin.f32 %v1955_v54, 0.0 }
 0x153   :  { %938 = vperm.xlu1 %1248, %v789_v62   ;;  %v1393_v37 = vpop.eup %1392  ;;  %v671_v41 = vadd.f32 1.0, %v1391_v36  ;;  %1410 = vlog2.f32 %v667_v56  ;;  %v456_v33 = vmin.f32 %v1966_v19, 0.0  ;;  %v460_v7 = vmin.f32 %v1963_v61, 0.0 }
 0x154   :  { %953 = vperm.xlu0 %1249, %v794_v0   ;;  %v1395_v52 = vpop.eup %1394  ;;  %v750_v12 = vmul.f32 0.6931472, %v1393_v37  ;;  %v791_v39 = vsub.f32 %v455_v25, %v742_v42  ;;  %v436_v48 = vmin.f32 %v1982_v5, 0.0  ;;  %v440_v10 = vmin.f32 %v1989_v32, 0.0 }
 0x155   :  { %v1397_v27 = vpop.eup %1396  ;;  %v702_v31 = vmul.f32 0.6931472, %v1395_v52  ;;  %1412 = vlog2.f32 %v671_v41  ;;  %v457_v47 = vmin.f32 %v1992_v29, 0.0  ;;  %v461_v51 = vmin.f32 %v1999_v26, 0.0 }
 0x156   :  { %v1399_v35 = vpop.eup %1398  ;;  %v651_v28 = vadd.f32 1.0, %v1397_v27  ;;  %v795_v49 = vsub.f32 %v459_v1, %v750_v12  ;;  %v441_v63 = vmin.f32 %v2013_v30, 0.0  ;;  %v462_v43 = vmin.f32 %v2022_v14, 0.0 }
 0x157   :  { %890 = vperm.xlu1 %1248, %v773_v40   ;;  %v1401_v34 = vpop.eup %1400  ;;  %v710_v13 = vmul.f32 0.6931472, %v1399_v35  ;;  %v771_v4 = vsub.f32 %v435_v23, %v702_v31 }
 0x158   :  { %881 = vperm.xlu0 %1249, %v770_v2   ;;  %v1403_v22 = vpop.eup %1402  ;;  %v744_v60 = vmul.f32 0.6931472, %v1401_v34  ;;  %1414 = vlog2.f32 %v651_v28  ;;  %v2349_v28 = vld [vmem:[#allocation6_spill] sm:$0xff] }
 0x159   :  { %v1405_v8 = vpop.eup %1404  ;;  %v672_v57 = vadd.f32 1.0, %v1403_v22  ;;  %v775_v38 = vsub.f32 %v439_v55, %v710_v13  ;;  %v971_v22 = vadd.s32 4294967288, %v2349_v28  ;;  %v978_v13 = vadd.s32 4294967280, %v2349_v28 }
 0x15a   :  { %v1407_v11 = vpop.eup %1406  ;;  %v752_v21 = vmul.f32 0.6931472, %v1405_v8  ;;  %v792_v50 = vsub.f32 %v456_v33, %v744_v60  ;;  %v992_v60 = vadd.s32 4294967264, %v2349_v28  ;;  %v999_v33 = vadd.s32 4294967256, %v2349_v28 }
 0x15b   :  { %941 = vperm.xlu1 %1248, %v790_v15   ;;  %v704_v59 = vmul.f32 0.6931472, %v1407_v11  ;;  %1416 = vlog2.f32 %v672_v57  ;;  %v2350_v11 = vld [vmem:[#allocation5_spill] sm:$0xff] }
 0x15c   :  { %944 = vperm.xlu0 %1249, %v791_v39   ;;  %v1409_v16 = vpop.eup %1408  ;;  %v796_v54 = vsub.f32 %v460_v7, %v752_v21  ;;  %v2111_v55 = vsub.s32 %v2349_v28, %v2350_v11  ;;  %v2115_v57 = vsub.s32 %v971_v22, %v2350_v11  ;;  %v1006_v21 = vadd.s32 4294967248, %v2349_v28 }
 0x15d   :  { %v1411_v6 = vpop.eup %1410  ;;  %v712_v58 = vmul.f32 0.6931472, %v1409_v16  ;;  %v772_v17 = vsub.f32 %v436_v48, %v704_v59  ;;  %v2122_v59 = vsub.s32 %v978_v13, %v2350_v11 }
 0x15e   :  { %v746_v19 = vmul.f32 0.6931472, %v1411_v6  ;;  %v1027_v6 = vadd.s32 4294967224, %v2349_v28 }
 0x15f   :  { %956 = vperm.xlu1 %1248, %v795_v49   ;;  %v1413_v20 = vpop.eup %1412  ;;  %v776_v62 = vsub.f32 %v440_v10, %v712_v58  ;;  %v1034_v58 = vadd.s32 4294967216, %v2349_v28  ;;  %v1009_v10 = vsub.s32 %v1006_v21, %v2350_v11 }
 0x160   :  { %884 = vperm.xlu0 %1249, %v771_v4   ;;  %v754_v3 = vmul.f32 0.6931472, %v1413_v20  ;;  %v793_v61 = vsub.f32 %v457_v47, %v746_v19  ;;  %v985_v4 = vadd.s32 4294967272, %v2349_v28  ;;  %v1002_v20 = vsub.s32 %v999_v33, %v2350_v11 }
 0x161   :  { %v1041_v19 = vadd.s32 4294967208, %v2349_v28 }
 0x162   :  { %v1415_v18 = vpop.eup %1414  ;;  %v797_v5 = vsub.f32 %v461_v51, %v754_v3  ;;  %v2129_v48 = vsub.s32 %v985_v4, %v2350_v11 }
 0x163   :  { %896 = vperm.xlu1 %1248, %v775_v38   ;;  %v714_v0 = vmul.f32 0.6931472, %v1415_v18  ;;  %v1013_v38 = vadd.s32 4294967240, %v2349_v28 }
 0x164   :  { %947 = vperm.xlu0 %1249, %v792_v50   ;;  %v1020_v50 = vadd.s32 4294967232, %v2349_v28 }
 0x165   :  { %v1417_v53 = vpop.eup %1416  ;;  %v777_v32 = vsub.f32 %v441_v63, %v714_v0  ;;  %v1016_v47 = vsub.s32 %v1013_v38, %v2350_v11  ;;  %v1069_v0 = vadd.s32 4294967176, %v2349_v28 }
 0x166   :  { %v756_v24 = vmul.f32 0.6931472, %v1417_v53  ;;  %v2144_v18 = vsub.s32 %v1020_v50, %v2350_v11 }
 0x167   :  { %959 = vperm.xlu1 %1248, %v796_v54   ;;  %v2132_v54 = vsub.s32 %v992_v60, %v2350_v11 }
 0x168   :  { %887 = vperm.xlu0 %1249, %v772_v17   ;;  %v798_v29 = vsub.f32 %v462_v43, %v756_v24  ;;  %v1048_v17 = vadd.s32 4294967200, %v2349_v28 }
 0x16b   :  { %899 = vperm.xlu1 %1248, %v776_v62   ;;  %v1055_v62 = vadd.s32 4294967192, %v2349_v28 }
 0x16c   :  { %950 = vperm.xlu0 %1249, %v793_v61   ;;  %v2147_v61 = vsub.s32 %v1027_v6, %v2350_v11 }
 0x16f   :  { %962 = vperm.xlu1 %1248, %v797_v5   ;;  %v1062_v5 = vadd.s32 4294967184, %v2349_v28  ;;  %v2167_v28 = vsub.s32 %v1041_v19, %v2350_v11 }
 0x173   :  { %902 = vperm.xlu1 %1248, %v777_v32   ;;  %v2160_v32 = vsub.s32 %v1034_v58, %v2350_v11 }
 0x177   :  { %965 = vperm.xlu1 %1248, %v798_v29  }
 0x198   :  { %v2051_v45 = vpop.permute.xlu0 %845 }
 0x199   :  { %v2053_v36 = vpop.permute.xlu1 %842  ;;  %v975_v63 = vrot.slane %v2051_v45, %v2115_v57 }
 0x19a   :  { %v970_v53 = vrot.slane %v2053_v36, %v2111_v55  ;;  %v2170_v36 = vsub.s32 %v1048_v17, %v2350_v11 }
 0x19c   :  { %v977_v60 = vsel %vm976_vm2, %v975_v63, %v970_v53 }
 0x1a0   :  { %v2055_v26 = vpop.permute.xlu0 %848 }
 0x1a1   :  { %v2057_v56 = vpop.permute.xlu1 %905  ;;  %v982_v43 = vrot.slane %v2055_v26, %v2122_v59  ;;  %v2179_v26 = vsub.s32 %v1055_v62, %v2350_v11 }
 0x1a2   :  { %v1103_v45 = vrot.slane %v2057_v56, %v2111_v55  ;;  %v2188_v56 = vsub.s32 %v1062_v5, %v2350_v11 }
 0x1a4   :  { %v2059_v40 = vpop.permute.xlu0 %851 }
 0x1a6   :  { %v2061_v44 = vpop.permute.xlu1 %908 }
 0x1a7   :  { %v1107_v24 = vrot.slane %v2061_v44, %v2115_v57  ;;  %v989_v44 = vrot.slane %v2059_v40, %v2129_v48 }
 0x1a8   :  { %v2063_v30 = vpop.permute.xlu0 %854 }
 0x1a9   :  { %v996_v13 = vrot.slane %v2063_v30, %v2132_v54  ;;  %v1108_v33 = vsel %vm976_vm2, %v1107_v24, %v1103_v45 }
 0x1ab   :  { %v2065_v37 = vpop.permute.xlu1 %911 }
 0x1ac   :  { %v2067_v14 = vpop.permute.xlu0 %857  ;;  %v1112_v29 = vrot.slane %v2065_v37, %v2122_v59 }
 0x1ad   :  { %v1003_v21 = vrot.slane %v2067_v14, %v1002_v20 }
 0x1ae   :  { %v1113_v38 = vsel %vm983_vm3, %v1112_v29, %v1108_v33 }
 0x1b0   :  { %v2069_v2 = vpop.permute.xlu1 %914 }
 0x1b1   :  { %v2071_v42 = vpop.permute.xlu0 %860  ;;  %v1117_v22 = vrot.slane %v2069_v2, %v2129_v48  ;;  %v2193_v2 = vsub.s32 %v1069_v0, %v2350_v11 }
 0x1b2   :  { %v1010_v50 = vrot.slane %v2071_v42, %v1009_v10 }
 0x1b3   :  { %v1118_v58 = vsel %vm990_vm4, %v1117_v22, %v1113_v38 }
 0x1b4   :  { %v2073_v52 = vpop.permute.xlu1 %917 }
 0x1b5   :  { %v2075_v46 = vpop.permute.xlu0 %863  ;;  %v1122_v4 = vrot.slane %v2073_v52, %v2132_v54  ;;  %v984_v52 = vsel %vm983_vm3, %v982_v43, %v977_v60 }
 0x1b6   :  { %v991_v11 = vsel %vm990_vm4, %v989_v44, %v984_v52  ;;  %v1017_v19 = vrot.slane %v2075_v46, %v1016_v47 }
 0x1b9   :  { %v2077_v9 = vpop.permute.xlu1 %920 }
 0x1ba   :  { %v2079_v25 = vpop.permute.xlu0 %866  ;;  %v1127_v30 = vrot.slane %v2077_v9, %v1002_v20  ;;  %v998_v9 = vsel %vm997_vm5, %v996_v13, %v991_v11  ;;  %v1123_v20 = vsel %vm997_vm5, %v1122_v4, %v1118_v58 }
 0x1bb   :  { %v1024_v42 = vrot.slane %v2079_v25, %v2144_v18  ;;  %v1005_v62 = vsel %vm1004_vm6, %v1003_v21, %v998_v9 }
 0x1bc   :  { %v1128_v5 = vsel %vm1004_vm6, %v1127_v30, %v1123_v20  ;;  %vm1208_vm6 = vcmask 1041408  }
 0x1bd   :  { %v2081_v41 = vpop.permute.xlu1 %923 }
 0x1be   :  { %v2083_v27 = vpop.permute.xlu0 %869  ;;  %v1132_v6 = vrot.slane %v2081_v41, %v1009_v10 }
 0x1bf   :  { %v1031_v46 = vrot.slane %v2083_v27, %v2147_v61 }
 0x1c0   :  { %v1133_v0 = vsel %vm1011_vm7, %v1132_v6, %v1128_v5 }
 0x1c2   :  { %v2085_v15 = vpop.permute.xlu1 %926 }
 0x1c3   :  { %v2087_v12 = vpop.permute.xlu0 %872  ;;  %v1137_v14 = vrot.slane %v2085_v15, %v1016_v47  ;;  %v1012_v47 = vsel %vm1011_vm7, %v1010_v50, %v1005_v62  ;;  %vm1210_vm7 = vcmask 320512  }
 0x1c4   :  { %v1038_v25 = vrot.slane %v2087_v12, %v2160_v32 }
 0x1c5   :  { %v1138_v53 = vsel %vm1018_vm8, %v1137_v14, %v1133_v0 }
 0x1c6   :  { %v2089_v35 = vpop.permute.xlu1 %929 }
 0x1c7   :  { %v2091_v39 = vpop.permute.xlu0 %875  ;;  %v1142_v41 = vrot.slane %v2089_v35, %v2144_v18  ;;  %v1019_v18 = vsel %vm1018_vm8, %v1017_v19, %v1012_v47 }
 0x1c8   :  { %v1045_v27 = vrot.slane %v2091_v39, %v2167_v28  ;;  %v1026_v63 = vsel %vm1025_vm9, %v1024_v42, %v1019_v18 }
 0x1c9   :  { %v1143_v24 = vsel %vm1025_vm9, %v1142_v41, %v1138_v53  ;;  %v1033_v43 = vsel %vm1032_vm10, %v1031_v46, %v1026_v63 }
 0x1ca   :  { %v2093_v31 = vpop.permute.xlu1 %932 }
 0x1cb   :  { %v2095_v34 = vpop.permute.xlu0 %878  ;;  %v1147_v15 = vrot.slane %v2093_v31, %v2147_v61 }
 0x1cc   :  { %v1052_v12 = vrot.slane %v2095_v34, %v2170_v36 }
 0x1cd   :  { %v1148_v29 = vsel %vm1032_vm10, %v1147_v15, %v1143_v24  ;;  %v1445_v15 = vmov 0.0  }
 0x1ce   :  { %v2097_v1 = vpop.permute.xlu1 %935 }
 0x1cf   :  { %v2099_v23 = vpop.permute.xlu0 %893  ;;  %v1152_v35 = vrot.slane %v2097_v1, %v2160_v32 }
 0x1d0   :  { %v1083_v19 = vrot.slane %v2099_v23, %v2115_v57 }
 0x1d1   :  { %v1153_v45 = vsel %vm1039_vm11, %v1152_v35, %v1148_v29 }
 0x1d2   :  { %v2102_v49 = vpop.permute.xlu1 %938 }
 0x1d3   :  { %v2105_v8 = vpop.permute.xlu0 %953  ;;  %v1157_v31 = vrot.slane %v2102_v49, %v2167_v28  ;;  %v1040_v28 = vsel %vm1039_vm11, %v1038_v25, %v1033_v43 }
 0x1d4   :  { %v1182_v14 = vrot.slane %v2105_v8, %v2111_v55 }
 0x1d5   :  { %v1158_v44 = vsel %vm1046_vm12, %v1157_v31, %v1153_v45 }
 0x1d6   :  { %v2119_v16 = vpop.permute.xlu1 %890 }
 0x1d7   :  { %v2126_v7 = vpop.permute.xlu0 %881  ;;  %v1079_v50 = vrot.slane %v2119_v16, %v2111_v55 }
 0x1d8   :  { %v1059_v39 = vrot.slane %v2126_v7, %v2179_v26 }
 0x1da   :  { %v2140_v3 = vpop.permute.xlu1 %941 }
 0x1db   :  { %v2149_v51 = vpop.permute.xlu0 %944  ;;  %v1162_v1 = vrot.slane %v2140_v3, %v2170_v36  ;;  %v1047_v36 = vsel %vm1046_vm12, %v1045_v27, %v1040_v28 }
 0x1dc   :  { %v1167_v49 = vrot.slane %v2149_v51, %v2179_v26  ;;  %v1054_v13 = vsel %vm1053_vm13, %v1052_v12, %v1047_v36 }
 0x1dd   :  { %v1163_v51 = vsel %vm1053_vm13, %v1162_v1, %v1158_v44  ;;  %v1061_v4 = vsel %vm1060_vm14, %v1059_v39, %v1054_v13 }
 0x1de   :  { %v2181_v37 = vpop.permute.xlu1 %956 }
 0x1df   :  { %v2190_v40 = vpop.permute.xlu0 %884  ;;  %v1186_v6 = vrot.slane %v2181_v37, %v2115_v57  ;;  %v1084_v37 = vsel %vm976_vm2, %v1083_v19, %v1079_v50 }
 0x1e0   :  { %v1066_v34 = vrot.slane %v2190_v40, %v2188_v56  ;;  %v1168_v40 = vsel %vm1060_vm14, %v1167_v49, %v1163_v51 }
 0x1e1   :  { %v1187_v42 = vsel %vm976_vm2, %v1186_v6, %v1182_v14  ;;  %vm16_vm2 = vcmask 0  }
 0x1e2   :  { %v2207_v17 = vpop.permute.xlu1 %896  ;;  %v1068_v60 = vsel %vm1067_vm15, %v1066_v34, %v1061_v4  ;;  %17 = vst.msk [vmem:[#allocation2] sm:$0x1] %vm16_vm2, %v1445_v15 }
 0x1e3   :  { %v948_v10 = vpop.permute.xlu0 %947  ;;  %v1088_v58 = vrot.slane %v2207_v17, %v2122_v59 }
 0x1e4   :  { %v1172_v3 = vrot.slane %v948_v10, %v2188_v56 }
 0x1e5   :  { %v1089_v17 = vsel %vm983_vm3, %v1088_v58, %v1084_v37 }
 0x1e6   :  { %v960_v61 = vpop.permute.xlu1 %959  ;;  %v1173_v33 = vsel %vm1067_vm15, %v1172_v3, %v1168_v40 }
 0x1e7   :  { %v888_v32 = vpop.permute.xlu0 %887 }
 0x1e8   :  { %v1073_v7 = vrot.slane %v888_v32, %v2193_v2 }
 0x1e9   :  { %v1222_v31 = vld [vmem:[#allocation2] sm:$0x1] }
 0x1ea   :  { %v900_v22 = vpop.permute.xlu1 %899  ;;  %v1075_v21 = vsel %vm1074_vm0, %v1073_v7, %v1068_v60 }
 0x1eb   :  { %v951_v26 = vpop.permute.xlu0 %950  ;;  %v1093_v9 = vrot.slane %v900_v22, %v2129_v48 }
 0x1ec   :  { %v1177_v56 = vrot.slane %v951_v26, %v2193_v2  ;;  %v1191_v2 = vrot.slane %v960_v61, %v2122_v59 }
 0x1ed   :  { %v1094_v57 = vsel %vm990_vm4, %v1093_v9, %v1089_v17 }
 0x1ee   :  { %v963_v30 = vpop.permute.xlu1 %962  ;;  %v1178_v52 = vsel %vm1074_vm0, %v1177_v56, %v1173_v33  ;;  %v1192_v59 = vsel %vm983_vm3, %v1191_v2, %v1187_v42 }
 0x1ef   :  { %v1204_v38 = vsel %vm1203_vm1, %v1178_v52, %v1075_v21  ;;  %v1196_v20 = vrot.slane %v963_v30, %v2129_v48 }
 0x1f0   :  { %v1209_v62 = vsel %vm1208_vm6, %v1204_v38, 0.0 }
 0x1f1   :  { %v1197_v8 = vsel %vm990_vm4, %v1196_v20, %v1192_v59 }
 0x1f2   :  { %v903_v11 = vpop.permute.xlu1 %902 }
 0x1f3   :  { %v1098_v16 = vrot.slane %v903_v11, %v2132_v54 }
 0x1f5   :  { %v1099_v55 = vsel %vm997_vm5, %v1098_v16, %v1094_v57 }
 0x1f6   :  { %v966_v41 = vpop.permute.xlu1 %965 }
 0x1f7   :  { %v1201_v23 = vrot.slane %v966_v41, %v2132_v54 }
 0x1f9   :  { %v1202_v48 = vsel %vm997_vm5, %v1201_v23, %v1197_v8 }
 0x1fa   :  { %v1205_v10 = vsel %vm1203_vm1, %v1202_v48, %v1099_v55 }
 0x1fb   :  { %v1211_v5 = vsel %vm1210_vm7, %v1205_v10, 0.0 }
 0x1fc   :  { %v1212_v46 = vadd.f32 %v1211_v5, %v1209_v62 }
 0x1fe   :  { %1213 = vadd.xlane.f32.xlu0 %v1212_v46 }
 0x28b   :  { %v1214_v54 = vpop.xlane.xlu0 %1213 }
 0x28c   :  { %v1215_v47 = vsel %vm1208_vm6, %v1214_v54, 0.0 }
 0x28d   :  { %v1216_v0 = vrot.slane %v1215_v47, 4 }
 0x28f   :  { %v1217_v25 = vadd.f32 %v1216_v0, %v1215_v47 }
 0x291   :  { %v1218_v35 = vrot.slane %v1217_v25, 2 }
 0x293   :  { %v1219_v18 = vadd.f32 %v1218_v35, %v1217_v25 }
 0x295   :  { %v1220_v53 = vrot.slane %v1219_v18, 1 }
 0x297   :  { %v1221_v27 = vadd.f32 %v1220_v53, %v1219_v18 }
 0x299   :  { %v1224_v61 = vmul.f32 0.125, %v1221_v27 }
 0x29b   :  { %v1225_v63 = vadd.f32 %v1224_v61, %v1222_v31 }
 0x29d   :  { %1227 = vst.msk [vmem:[#allocation2] sm:$0x1] %vm16_vm2, %v1225_v63 }
 0x29e   :  { %1429 = shalt.err (!%p1426_p4)
}
 0x29f   :  { %s1430_s13 = scalar_lea.hbm %s2299_s2, 16 }
 0x2a0   :  { %p1431_p5 = scmp.ne.s32.totalorder %s2299_s2, %s1430_s13  ;;  %p1434_p6 = scmp.lt.u32.totalorder %s1430_s13, %s2299_s2 }
 0x2a2   :  { %p1436_p7 = pnand %p1434_p6, %p1431_p5 }
 0x2a4   :  { %1439 = shalt.err (!%p1436_p7)
}
 0x2a5   :  { %1237 = dma.vmem_to_hbm [thread:$0]  %s1235_s8, 16, %s2299_s2, [#allocation3]  }
 0x2a6   :  { %1440 = dma.done.wait [#allocation3], 16  }
 0x2a7   :  { %1441 = vsyncadd [#allocation3], 4294967280 }
 0x2a8   :  { %1241 = vsyncpa [#allocation3], 1 }

</bundles_post_ra>
